<compile_context>
chip_gen: v7x
topology: tpu7x:2x2x1
jax: 0.10.0
libtpu: 0.0.40
codegen_flags: <defaults>
</compile_context>

<pallas_src>
import jax
import jax.numpy as jnp
from jax.experimental import pallas as pl
from jax.experimental.pallas import tpu as pltpu

INPUT_DIM = 42
OUTPUT_DIM = 7
D1 = 256            # embed_dim
D2 = 512            # 2 * embed_dim
PAD_OUT = 128       # lane-dense padded output width
BN_EPS = 1e-5
NEG_BIG = -1e30     # padded logit bias (kept in f32!) -> exp underflows to 0

# Rough peak live f32 bytes per batch row inside the fused kernel (h2 + its
# centered copy + bf16 copies + logits/exp); used only for path selection.
_FUSED_BYTES_PER_ROW = 6 * 1024


def _vmem_limit_bytes():
    """Generation-aware VMEM cap: ~80% of physical (102 MiB v5e/v6e, 51 MiB v7x)."""
    try:
        cap = pltpu.get_tpu_info().vmem_capacity_bytes
    except Exception:
        cap = 64 * 1024 * 1024
    return max(32 * 1024 * 1024, int(cap * 0.8))


# ----------------------------------------------------------------------------
# Fused single-invocation kernel (whole batch resident in VMEM).
# ----------------------------------------------------------------------------
def _fused_kernel(x_ref, w1_ref, g1_ref, be1_ref, w2_ref, g2_ref, be2_ref,
                  w3_ref, b3_ref, out_ref):
    # Linear(42 -> 256); pre-BN bias omitted (cancelled by BN mean subtraction).
    h = jnp.dot(x_ref[...], w1_ref[...], preferred_element_type=jnp.float32)

    # Training-mode BatchNorm(256) + ReLU; centered two-pass variance, FMA apply.
    mu = jnp.mean(h, axis=0, keepdims=True)
    d = h - mu
    var = jnp.mean(d * d, axis=0, keepdims=True)
    h = jnp.maximum(d * (g1_ref[...] * jax.lax.rsqrt(var + BN_EPS)) + be1_ref[...], 0.0)

    # Linear(256 -> 512) + BatchNorm(512) + ReLU.
    h = jnp.dot(h.astype(jnp.bfloat16), w2_ref[...], preferred_element_type=jnp.float32)
    mu = jnp.mean(h, axis=0, keepdims=True)
    d = h - mu
    var = jnp.mean(d * d, axis=0, keepdims=True)
    h = jnp.maximum(d * (g2_ref[...] * jax.lax.rsqrt(var + BN_EPS)) + be2_ref[...], 0.0)

    # Linear(512 -> 128 padded head) + softmax (f32 math, bf16 final store).
    logits = jnp.dot(h.astype(jnp.bfloat16), w3_ref[...],
                     preferred_element_type=jnp.float32) + b3_ref[...]
    m = jnp.max(logits, axis=-1, keepdims=True)
    e = jnp.exp(logits - m)
    s = jnp.sum(e, axis=-1, keepdims=True)
    r = pl.reciprocal(s, approx=True)
    r = r * (2.0 - s * r)                 # one Newton step -> full f32 accuracy
    out_ref[...] = (e * r).astype(out_ref.dtype)


# ----------------------------------------------------------------------------
# Batch-tiled, two-phase-BN kernels.
# ----------------------------------------------------------------------------
def _stats2_kernel(x_ref, w1_ref, sc1_ref, sh1_ref, w2_ref, stat_ref):
    """Per-tile partial stats for BN2: row 0 = sum(h2), row 1 = sum((h2-mu_t)^2)."""
    h = jnp.dot(x_ref[...], w1_ref[...], preferred_element_type=jnp.float32)
    a1 = jnp.maximum(h * sc1_ref[...] + sh1_ref[...], 0.0)
    h2 = jnp.dot(a1.astype(jnp.bfloat16), w2_ref[...],
                 preferred_element_type=jnp.float32)
    s = jnp.sum(h2, axis=0, keepdims=True)               # [1, D2]
    mu_t = s * (1.0 / h2.shape[0])
    d = h2 - mu_t
    m2 = jnp.sum(d * d, axis=0, keepdims=True)           # [1, D2] (centered)
    stat_ref[...] = jnp.concatenate([s, m2], axis=0).reshape(1, 2, h2.shape[1])


def _apply_kernel(x_ref, w1_ref, sc1_ref, sh1_ref, w2_ref, sc2_ref, sh2_ref,
                  w3_ref, b3_ref, out_ref):
    """Full forward for one batch tile with precomputed BN scale/shift."""
    h = jnp.dot(x_ref[...], w1_ref[...], preferred_element_type=jnp.float32)
    a1 = jnp.maximum(h * sc1_ref[...] + sh1_ref[...], 0.0)
    h2 = jnp.dot(a1.astype(jnp.bfloat16), w2_ref[...],
                 preferred_element_type=jnp.float32)
    a2 = jnp.maximum(h2 * sc2_ref[...] + sh2_ref[...], 0.0)
    logits = jnp.dot(a2.astype(jnp.bfloat16), w3_ref[...],
                     preferred_element_type=jnp.float32) + b3_ref[...]
    m = jnp.max(logits, axis=-1, keepdims=True)
    e = jnp.exp(logits - m)
    s = jnp.sum(e, axis=-1, keepdims=True)
    r = pl.reciprocal(s, approx=True)
    r = r * (2.0 - s * r)
    out_ref[...] = (e * r).astype(out_ref.dtype)


# ----------------------------------------------------------------------------
# Wrappers.
# ----------------------------------------------------------------------------
def _forward_fused(xb, p, out_dtype):
    B = xb.shape[0]
    args = (xb, p["w1"], p["g1"], p["be1"], p["w2"], p["g2"], p["be2"],
            p["w3p"], p["b3p"])
    vmem = pl.BlockSpec(memory_space=pltpu.MemorySpace.VMEM)
    return pl.pallas_call(
        _fused_kernel,
        out_shape=jax.ShapeDtypeStruct((B, PAD_OUT), out_dtype),
        in_specs=[vmem] * len(args),
        out_specs=vmem,
        compiler_params=pltpu.CompilerParams(vmem_limit_bytes=_vmem_limit_bytes()),
    )(*args)


def _bn_scale_shift(mu, var, gamma, beta):
    scale = gamma * jax.lax.rsqrt(var + BN_EPS)
    return scale, beta - mu * scale


def _forward_tiled(xb, p, tile, out_dtype):
    B = xb.shape[0]
    T = B // tile
    limit = _vmem_limit_bytes()

    # ---- Phase 1: BN1 batch statistics via the covariance identity ----------
    # h1 = x @ W1 is linear in x, so mean(h1) = mean(x) @ W1 and
    # Var(h1)_j = w_j^T Cov(x) w_j with Cov(x) only [42,42] -> exact, centered,
    # ~B*42*42 MACs (negligible); no Pallas pass needed for layer-1 stats.
    xf = xb.astype(jnp.float32)
    w1f = p["w1"].astype(jnp.float32)
    mu_x = jnp.mean(xf, axis=0, keepdims=True)                  # [1, 42]
    xc = xf - mu_x
    cov_x = (xc.T @ xc) * (1.0 / B)                             # [42, 42]
    mu1 = mu_x @ w1f                                            # [1, D1]
    var1 = jnp.sum((cov_x @ w1f) * w1f, axis=0, keepdims=True)  # [1, D1]
    sc1, sh1 = _bn_scale_shift(mu1, var1, p["g1"], p["be1"])

    # ---- Phase 2: per-tile centered partial stats for BN2 -------------------
    # Each tile writes its own output block -> no cross-tile accumulator, so
    # the batch axis is "parallel" (megacore-shardable on v7x).
    stats = pl.pallas_call(
        _stats2_kernel,
        out_shape=jax.ShapeDtypeStruct((T, 2, D2), jnp.float32),
        grid=(T,),
        in_specs=[
            pl.BlockSpec((tile, INPUT_DIM), lambda i: (i, 0)),
            pl.BlockSpec((INPUT_DIM, D1), lambda i: (0, 0)),
            pl.BlockSpec((1, D1), lambda i: (0, 0)),
            pl.BlockSpec((1, D1), lambda i: (0, 0)),
            pl.BlockSpec((D1, D2), lambda i: (0, 0)),
        ],
        out_specs=pl.BlockSpec((1, 2, D2), lambda i: (i, 0, 0)),
        compiler_params=pltpu.CompilerParams(
            dimension_semantics=("parallel",), vmem_limit_bytes=limit),
    )(xb, p["w1"], sc1, sh1, p["w2"])

    # Chan-style combination of per-tile (sum, centered-M2) partials.
    tile_sum = stats[:, 0, :]                                   # [T, D2]
    tile_m2 = stats[:, 1, :]                                    # [T, D2]
    tile_mu = tile_sum * (1.0 / tile)
    mu2 = jnp.mean(tile_mu, axis=0, keepdims=True)              # equal tile sizes
    var2 = (jnp.sum(tile_m2, axis=0, keepdims=True)
            + tile * jnp.sum((tile_mu - mu2) ** 2, axis=0, keepdims=True)) * (1.0 / B)
    sc2, sh2 = _bn_scale_shift(mu2, var2, p["g2"], p["be2"])

    # ---- Phase 3: apply pass, fully parallel over batch tiles ---------------
    return pl.pallas_call(
        _apply_kernel,
        out_shape=jax.ShapeDtypeStruct((B, PAD_OUT), out_dtype),
        grid=(T,),
        in_specs=[
            pl.BlockSpec((tile, INPUT_DIM), lambda i: (i, 0)),
            pl.BlockSpec((INPUT_DIM, D1), lambda i: (0, 0)),
            pl.BlockSpec((1, D1), lambda i: (0, 0)),
            pl.BlockSpec((1, D1), lambda i: (0, 0)),
            pl.BlockSpec((D1, D2), lambda i: (0, 0)),
            pl.BlockSpec((1, D2), lambda i: (0, 0)),
            pl.BlockSpec((1, D2), lambda i: (0, 0)),
            pl.BlockSpec((D2, PAD_OUT), lambda i: (0, 0)),
            pl.BlockSpec((1, PAD_OUT), lambda i: (0, 0)),
        ],
        out_specs=pl.BlockSpec((tile, PAD_OUT), lambda i: (i, 0)),
        compiler_params=pltpu.CompilerParams(
            dimension_semantics=("parallel",), vmem_limit_bytes=limit),
    )(xb, p["w1"], sc1, sh1, p["w2"], sc2, sh2, p["w3p"], p["b3p"])


def _pick_tile(B, max_tile=2048):
    # Prefer MXU-friendly multiples of 256; else any multiple-of-8 divisor.
    for cand in (2048, 1024, 512, 256):
        if cand <= max_tile and B % cand == 0:
            return cand
    best = None
    c = 8
    while c <= min(B, max_tile):
        if B % c == 0:
            best = c
        c += 8
    return best


def policy_agent_forward(x, params, *, batch_tile=None, out_dtype=jnp.bfloat16):
    """x: [B, 42] float -> action probabilities [B, 7] (training-mode BatchNorm).

    Path selection:
      * fused single pallas_call (whole batch VMEM-resident) when it fits —
        minimum matmul work, optimal on single-TensorCore v5e/v6e;
      * batch-tiled two-phase-BN path (stats pass + parallel apply pass) for
        large batches or explicit `batch_tile` — bounds VMEM, double-buffers
        the x / output streams, and lets the batch grid axis shard across
        v7x's two TensorCores.
    """
    B = x.shape[0]
    xb = x.astype(jnp.bfloat16)     # MXU operands are bf16 anyway; halves input DMA.

    if batch_tile is None:
        fused_max_rows = max(1024, (_vmem_limit_bytes() // 2) // _FUSED_BYTES_PER_ROW)
        if B <= fused_max_rows:
            out = _forward_fused(xb, params, out_dtype)
        else:
            tile = _pick_tile(B)
            out = (_forward_tiled(xb, params, tile, out_dtype) if tile is not None
                   else _forward_fused(xb, params, out_dtype))
    else:
        if batch_tile % 8 != 0 or B % batch_tile != 0:
            raise ValueError("batch_tile must be a multiple of 8 that divides B")
        out = _forward_tiled(xb, params, batch_tile, out_dtype)

    # Under jit this slice fuses with the consumer; callers wanting the
    # lane-dense padded [B, 128] block can call _forward_fused/_forward_tiled.
    return out[:, :OUTPUT_DIM]


# ----------------------------------------------------------------------------
# Parameters & reference.
# ----------------------------------------------------------------------------
def init_params(key):
    """PyTorch-default-style init (uniform +-1/sqrt(fan_in)).

    Weights stored bf16 (half the HBM->VMEM DMA, full MXU rate); biases / BN
    affine params stay f32.  b1/b2 kept only for the reference model — they
    are dead under training-mode BatchNorm.  w3/b3 lane-padded to 128 cols.
    """
    def linear(key, fan_in, fan_out):
        kw, kb = jax.random.split(key)
        bound = 1.0 / jnp.sqrt(float(fan_in))
        w = jax.random.uniform(kw, (fan_in, fan_out), jnp.float32, -bound, bound)
        b = jax.random.uniform(kb, (1, fan_out), jnp.float32, -bound, bound)
        return w, b

    k1, k2, k3 = jax.random.split(key, 3)
    w1, b1 = linear(k1, INPUT_DIM, D1)
    w2, b2 = linear(k2, D1, D2)
    w3, b3 = linear(k3, D2, OUTPUT_DIM)

    w3p = jnp.zeros((D2, PAD_OUT), jnp.float32).at[:, :OUTPUT_DIM].set(w3)
    b3p = jnp.full((1, PAD_OUT), NEG_BIG, jnp.float32).at[:, :OUTPUT_DIM].set(b3)

    return {
        "w1": w1.astype(jnp.bfloat16), "b1": b1,
        "g1": jnp.ones((1, D1), jnp.float32),
        "be1": jnp.zeros((1, D1), jnp.float32),
        "w2": w2.astype(jnp.bfloat16), "b2": b2,
        "g2": jnp.ones((1, D2), jnp.float32),
        "be2": jnp.zeros((1, D2), jnp.float32),
        "w3p": w3p.astype(jnp.bfloat16), "b3p": b3p,
    }


def _reference_forward(x, p):
    """Pure-JAX f32 reference with exact PyTorch semantics (biases included,
    training-mode BatchNorm), using the same bf16-rounded inputs/weights."""
    xf = x.astype(jnp.bfloat16).astype(jnp.float32)
    w1 = p["w1"].astype(jnp.float32)
    w2 = p["w2"].astype(jnp.float32)
    w3 = p["w3p"][:, :OUTPUT_DIM].astype(jnp.float32)
    b3 = p["b3p"][:, :OUTPUT_DIM]

    h = xf @ w1 + p["b1"]
    mu = h.mean(0, keepdims=True); var = ((h - mu) ** 2).mean(0, keepdims=True)
    h = jnp.maximum((h - mu) / jnp.sqrt(var + BN_EPS) * p["g1"] + p["be1"], 0.0)
    h = h @ w2 + p["b2"]
    mu = h.mean(0, keepdims=True); var = ((h - mu) ** 2).mean(0, keepdims=True)
    h = jnp.maximum((h - mu) / jnp.sqrt(var + BN_EPS) * p["g2"] + p["be2"], 0.0)
    return jax.nn.softmax(h @ w3 + b3, axis=-1)


if __name__ == "__main__":
    key = jax.random.PRNGKey(0)
    kx1, kx2, kp = jax.random.split(key, 3)
    params = init_params(kp)

    # --- fused (whole-batch-in-VMEM) path ------------------------------------
    B1 = 64
    x1 = jax.random.normal(kx1, (B1, INPUT_DIM), jnp.float32)
    probs1 = jax.block_until_ready(policy_agent_forward(x1, params))
    ref1 = _reference_forward(x1, params)
    assert probs1.shape == (B1, OUTPUT_DIM)
    p1 = probs1.astype(jnp.float32)
    assert jnp.allclose(jnp.sum(p1, axis=-1), 1.0, atol=1e-2)
    assert jnp.allclose(p1, ref1, atol=2e-2, rtol=2e-2)

    # --- batch-tiled two-phase-BN path (small tile forced for the self-test) --
    B2 = 128
    x2 = jax.random.normal(kx2, (B2, INPUT_DIM), jnp.float32)
    probs2 = jax.block_until_ready(
        policy_agent_forward(x2, params, batch_tile=64))
    ref2 = _reference_forward(x2, params)
    assert probs2.shape == (B2, OUTPUT_DIM)
    p2 = probs2.astype(jnp.float32)
    assert jnp.allclose(jnp.sum(p2, axis=-1), 1.0, atol=1e-2)
    assert jnp.allclose(p2, ref2, atol=2e-2, rtol=2e-2)

    print("KERNEL_OK")
</pallas_src>

<mosaic_0001>
module attributes {stable_mosaic.version = 11 : i64} {
  func.func @_fused_kernel(%arg0: memref<64x42xbf16, #tpu.memory_space<vmem>>, %arg1: memref<42x256xbf16, #tpu.memory_space<vmem>>, %arg2: memref<1x256xf32, #tpu.memory_space<vmem>>, %arg3: memref<1x256xf32, #tpu.memory_space<vmem>>, %arg4: memref<256x512xbf16, #tpu.memory_space<vmem>>, %arg5: memref<1x512xf32, #tpu.memory_space<vmem>>, %arg6: memref<1x512xf32, #tpu.memory_space<vmem>>, %arg7: memref<512x128xbf16, #tpu.memory_space<vmem>>, %arg8: memref<1x128xf32, #tpu.memory_space<vmem>>, %arg9: memref<64x128xbf16, #tpu.memory_space<vmem>>) attributes {dimension_semantics = [], scalar_prefetch = 0 : i64, scratch_operands = 0 : i64, tpu.core_type = #tpu.core_type<tc>} {
    %c0 = arith.constant 0 : index
    %c0_0 = arith.constant 0 : index
    %0 = vector.load %arg0[%c0, %c0_0] : memref<64x42xbf16, #tpu.memory_space<vmem>>, vector<64x42xbf16>
    %c0_1 = arith.constant 0 : index
    %c0_2 = arith.constant 0 : index
    %1 = vector.load %arg1[%c0_1, %c0_2] : memref<42x256xbf16, #tpu.memory_space<vmem>>, vector<42x256xbf16>
    %cst = arith.constant dense<0.000000e+00> : vector<64x256xf32>
    %2 = tpu.matmul %0, %1, %cst {dimension_numbers = #tpu.dot_dimension_numbers<[1], [0], [0], [1], [0, 0, 1, 1], [], []>} : vector<64x42xbf16>, vector<42x256xbf16>, vector<64x256xf32> -> vector<64x256xf32>
    %cst_3 = arith.constant dense<0.000000e+00> : vector<256xf32>
    %3 = vector.multi_reduction <add>, %2, %cst_3 [0] : vector<64x256xf32> to vector<256xf32>
    %4 = vector.shape_cast %3 : vector<256xf32> to vector<1x256xf32>
    %cst_4 = arith.constant 6.400000e+01 : f32
    %5 = vector.broadcast %cst_4 : f32 to vector<1x256xf32>
    %6 = arith.divf %4, %5 : vector<1x256xf32>
    %7 = vector.broadcast %6 : vector<1x256xf32> to vector<64x256xf32>
    %8 = arith.subf %2, %7 : vector<64x256xf32>
    %9 = arith.mulf %8, %8 : vector<64x256xf32>
    %cst_5 = arith.constant dense<0.000000e+00> : vector<256xf32>
    %10 = vector.multi_reduction <add>, %9, %cst_5 [0] : vector<64x256xf32> to vector<256xf32>
    %11 = vector.shape_cast %10 : vector<256xf32> to vector<1x256xf32>
    %cst_6 = arith.constant 6.400000e+01 : f32
    %12 = vector.broadcast %cst_6 : f32 to vector<1x256xf32>
    %13 = arith.divf %11, %12 : vector<1x256xf32>
    %c0_7 = arith.constant 0 : index
    %c0_8 = arith.constant 0 : index
    %14 = vector.load %arg2[%c0_7, %c0_8] : memref<1x256xf32, #tpu.memory_space<vmem>>, vector<1x256xf32>
    %cst_9 = arith.constant 9.99999974E-6 : f32
    %15 = vector.broadcast %cst_9 : f32 to vector<1x256xf32>
    %16 = arith.addf %13, %15 : vector<1x256xf32>
    %17 = math.rsqrt %16 : vector<1x256xf32>
    %18 = arith.mulf %14, %17 : vector<1x256xf32>
    %19 = vector.broadcast %18 : vector<1x256xf32> to vector<64x256xf32>
    %20 = arith.mulf %8, %19 : vector<64x256xf32>
    %c0_10 = arith.constant 0 : index
    %c0_11 = arith.constant 0 : index
    %21 = vector.load %arg3[%c0_10, %c0_11] : memref<1x256xf32, #tpu.memory_space<vmem>>, vector<1x256xf32>
    %22 = vector.broadcast %21 : vector<1x256xf32> to vector<64x256xf32>
    %23 = arith.addf %20, %22 : vector<64x256xf32>
    %cst_12 = arith.constant 0.000000e+00 : f32
    %24 = vector.broadcast %cst_12 : f32 to vector<64x256xf32>
    %25 = arith.maximumf %23, %24 : vector<64x256xf32>
    %26 = arith.truncf %25 : vector<64x256xf32> to vector<64x256xbf16>
    %c0_13 = arith.constant 0 : index
    %c0_14 = arith.constant 0 : index
    %27 = vector.load %arg4[%c0_13, %c0_14] : memref<256x512xbf16, #tpu.memory_space<vmem>>, vector<256x512xbf16>
    %cst_15 = arith.constant dense<0.000000e+00> : vector<64x512xf32>
    %28 = tpu.matmul %26, %27, %cst_15 {dimension_numbers = #tpu.dot_dimension_numbers<[1], [0], [0], [1], [0, 0, 1, 1], [], []>} : vector<64x256xbf16>, vector<256x512xbf16>, vector<64x512xf32> -> vector<64x512xf32>
    %cst_16 = arith.constant dense<0.000000e+00> : vector<512xf32>
    %29 = vector.multi_reduction <add>, %28, %cst_16 [0] : vector<64x512xf32> to vector<512xf32>
    %30 = vector.shape_cast %29 : vector<512xf32> to vector<1x512xf32>
    %cst_17 = arith.constant 6.400000e+01 : f32
    %31 = vector.broadcast %cst_17 : f32 to vector<1x512xf32>
    %32 = arith.divf %30, %31 : vector<1x512xf32>
    %33 = vector.broadcast %32 : vector<1x512xf32> to vector<64x512xf32>
    %34 = arith.subf %28, %33 : vector<64x512xf32>
    %35 = arith.mulf %34, %34 : vector<64x512xf32>
    %cst_18 = arith.constant dense<0.000000e+00> : vector<512xf32>
    %36 = vector.multi_reduction <add>, %35, %cst_18 [0] : vector<64x512xf32> to vector<512xf32>
    %37 = vector.shape_cast %36 : vector<512xf32> to vector<1x512xf32>
    %cst_19 = arith.constant 6.400000e+01 : f32
    %38 = vector.broadcast %cst_19 : f32 to vector<1x512xf32>
    %39 = arith.divf %37, %38 : vector<1x512xf32>
    %c0_20 = arith.constant 0 : index
    %c0_21 = arith.constant 0 : index
    %40 = vector.load %arg5[%c0_20, %c0_21] : memref<1x512xf32, #tpu.memory_space<vmem>>, vector<1x512xf32>
    %cst_22 = arith.constant 9.99999974E-6 : f32
    %41 = vector.broadcast %cst_22 : f32 to vector<1x512xf32>
    %42 = arith.addf %39, %41 : vector<1x512xf32>
    %43 = math.rsqrt %42 : vector<1x512xf32>
    %44 = arith.mulf %40, %43 : vector<1x512xf32>
    %45 = vector.broadcast %44 : vector<1x512xf32> to vector<64x512xf32>
    %46 = arith.mulf %34, %45 : vector<64x512xf32>
    %c0_23 = arith.constant 0 : index
    %c0_24 = arith.constant 0 : index
    %47 = vector.load %arg6[%c0_23, %c0_24] : memref<1x512xf32, #tpu.memory_space<vmem>>, vector<1x512xf32>
    %48 = vector.broadcast %47 : vector<1x512xf32> to vector<64x512xf32>
    %49 = arith.addf %46, %48 : vector<64x512xf32>
    %cst_25 = arith.constant 0.000000e+00 : f32
    %50 = vector.broadcast %cst_25 : f32 to vector<64x512xf32>
    %51 = arith.maximumf %49, %50 : vector<64x512xf32>
    %52 = arith.truncf %51 : vector<64x512xf32> to vector<64x512xbf16>
    %c0_26 = arith.constant 0 : index
    %c0_27 = arith.constant 0 : index
    %53 = vector.load %arg7[%c0_26, %c0_27] : memref<512x128xbf16, #tpu.memory_space<vmem>>, vector<512x128xbf16>
    %cst_28 = arith.constant dense<0.000000e+00> : vector<64x128xf32>
    %54 = tpu.matmul %52, %53, %cst_28 {dimension_numbers = #tpu.dot_dimension_numbers<[1], [0], [0], [1], [0, 0, 1, 1], [], []>} : vector<64x512xbf16>, vector<512x128xbf16>, vector<64x128xf32> -> vector<64x128xf32>
    %c0_29 = arith.constant 0 : index
    %c0_30 = arith.constant 0 : index
    %55 = vector.load %arg8[%c0_29, %c0_30] : memref<1x128xf32, #tpu.memory_space<vmem>>, vector<1x128xf32>
    %56 = vector.broadcast %55 : vector<1x128xf32> to vector<64x128xf32>
    %57 = arith.addf %54, %56 : vector<64x128xf32>
    %cst_31 = arith.constant dense<0xFF800000> : vector<64xf32>
    %58 = vector.multi_reduction <maximumf>, %57, %cst_31 [1] : vector<64x128xf32> to vector<64xf32>
    %59 = vector.shape_cast %58 : vector<64xf32> to vector<64x1xf32>
    %60 = vector.broadcast %59 : vector<64x1xf32> to vector<64x128xf32>
    %61 = arith.subf %57, %60 : vector<64x128xf32>
    %62 = math.exp %61 : vector<64x128xf32>
    %cst_32 = arith.constant dense<0.000000e+00> : vector<64xf32>
    %63 = vector.multi_reduction <add>, %62, %cst_32 [1] : vector<64x128xf32> to vector<64xf32>
    %64 = vector.shape_cast %63 : vector<64xf32> to vector<64x1xf32>
    %65 = tpu.reciprocal %64 {approx = true} : vector<64x1xf32> -> vector<64x1xf32>
    %66 = arith.mulf %64, %65 : vector<64x1xf32>
    %cst_33 = arith.constant 2.000000e+00 : f32
    %67 = vector.broadcast %cst_33 : f32 to vector<64x1xf32>
    %68 = arith.subf %67, %66 : vector<64x1xf32>
    %69 = arith.mulf %65, %68 : vector<64x1xf32>
    %70 = vector.broadcast %69 : vector<64x1xf32> to vector<64x128xf32>
    %71 = arith.mulf %62, %70 : vector<64x128xf32>
    %72 = arith.truncf %71 : vector<64x128xf32> to vector<64x128xbf16>
    %c0_34 = arith.constant 0 : index
    %c0_35 = arith.constant 0 : index
    %73 = vector.load %arg9[%c0_34, %c0_35] : memref<64x128xbf16, #tpu.memory_space<vmem>>, vector<64x128xbf16>
    tpu.vector_store %arg9[%c0_34, %c0_35], %72 {strides = array<i32>} : memref<64x128xbf16, #tpu.memory_space<vmem>>, vector<64x128xbf16>,
    return
  }
}

</mosaic_0001>

<bundles_post_ra>
// kernel: tpu_custom_call.1
= control target key start
LH: loop header
LB: loop body
LE: loop exit
PB: predicated region body
PF: predicated region fallthrough
CT: control target
= control target key end

     0   :  { %14 = vsyncpa [#allocation3], 0  ;;  %s2992_s0 = inlined_call_operand.vmem [shape: bf16[64,42], index: 0, kind: input, shape index: {}]   ;;  %s2993_s1 = inlined_call_operand.vmem [shape: bf16[42,256], index: 1, kind: input, shape index: {}]   ;;  %s2994_s2 = inlined_call_operand.vmem [shape: f32[1,256], index: 2, kind: input, shape index: {}]   ;;  %s2995_s3 = inlined_call_operand.vmem [shape: f32[1,256], index: 3, kind: input, shape index: {}]   ;;  %s2996_s4 = inlined_call_operand.hbm [shape: bf16[256,512], index: 4, kind: input, shape index: {}]   ;;  %s2997_s5 = inlined_call_operand.vmem [shape: f32[1,512], index: 5, kind: input, shape index: {}]   ;;  %s2998_s6 = inlined_call_operand.vmem [shape: f32[1,512], index: 6, kind: input, shape index: {}]   ;;  %s2999_s7 = inlined_call_operand.hbm [shape: bf16[512,128], index: 7, kind: input, shape index: {}]   ;;  %s3000_s8 = inlined_call_operand.vmem [shape: f32[1,128], index: 8, kind: input, shape index: {}]   ;;  %s3001_s9 = inlined_call_operand.hbm [shape: bf16[64,128], index: 9, kind: output, shape index: {}]  }
   0x1   :  { %15 = vsyncpa [#allocation6], 0 }
   0x2   :  { %16 = vsyncpa [#allocation4], 0  ;;  %s2353_s30 = smov [#allocation2]   ;;  %s2281_s13 = scalar_lea.hbm %s2996_s4, 8192 }
   0x3   :  { %s30_s10 = sshll.u32 %s2353_s30, 4  ;;  %p2282_p0 = scmp.ne.s32.totalorder %s2996_s4, %s2281_s13  ;;  %s31_s10 = int_to_ptr.vmem [resolvable:$true] %s30_s10 }
   0x4   :  { %p2285_p1 = scmp.lt.u32.totalorder %s2281_s13, %s2996_s4 }
   0x6   :  { %p2287_p2 = pnand %p2285_p1, %p2282_p0 }
   0x8   :  { %2290 = shalt.err (!%p2287_p2)
}
   0x9   :  { %s2291_s18 = scalar_lea.vmem %s31_s10, 8192  ;;  %p2296_p4 = scmp.lt.s32.totalorder %s31_s10, %s31_s10 }
   0xa   :  { %p2292_p3 = scmp.ne.s32.totalorder %s31_s10, %s2291_s18  ;;  %p2297_p5 = scmp.lt.s32.totalorder %s2291_s18, %s2291_s18 }
   0xc   :  { %p2298_p6 = por %p2297_p5, %p2296_p4 }
   0xe   :  { %p2299_p7 = pnand %p2298_p6, %p2292_p3 }
  0x10   :  { %2302 = shalt.err (!%p2299_p7)
}
  0x11   :  { %s2354_s19 = smov 256   ;;  %s2355_s20 = smov 16  }
  0x12   :  { %36 = dma.hbm_to_vmem [thread:$0]  %s2996_s4, 8192, %s31_s10, [#allocation3], %s2354_s19, %s2354_s19, %s2355_s20  }
  0x13   :  { %s2356_s23 = smov [#allocation5]   ;;  %s2303_s27 = scalar_lea.hbm %s2999_s7, 4096 }
  0x14   :  { %s46_s24 = sshll.u32 %s2356_s23, 4  ;;  %p2304_p8 = scmp.ne.s32.totalorder %s2999_s7, %s2303_s27  ;;  %s47_s24 = int_to_ptr.vmem [resolvable:$true] %s46_s24 }
  0x15   :  { %p2307_p9 = scmp.lt.u32.totalorder %s2303_s27, %s2999_s7 }
  0x17   :  { %p2309_p10 = pnand %p2307_p9, %p2304_p8 }
  0x19   :  { %2312 = shalt.err (!%p2309_p10)
}
  0x1a   :  { %s2313_s12 = scalar_lea.vmem %s47_s24, 4096  ;;  %p2318_p12 = scmp.lt.s32.totalorder %s47_s24, %s47_s24 }
  0x1b   :  { %p2314_p11 = scmp.ne.s32.totalorder %s47_s24, %s2313_s12  ;;  %p2319_p13 = scmp.lt.s32.totalorder %s2313_s12, %s2313_s12 }
  0x1d   :  { %p2320_p0 = por %p2319_p13, %p2318_p12 }
  0x1f   :  { %p2321_p1 = pnand %p2320_p0, %p2314_p11 }
  0x21   :  { %2324 = shalt.err (!%p2321_p1)
}
  0x22   :  { %s2357_s4 = smov 64   ;;  %s2358_s10 = smov 4  }
  0x23   :  { %52 = dma.hbm_to_vmem [thread:$0]  %s2999_s7, 4096, %s47_s24, [#allocation6], %s2357_s4, %s2357_s4, %s2358_s10  }
  0x24   :  { %2347 = dma.done.wait [#allocation3], 8192  }
  0x25   :  { %2348 = vsyncadd [#allocation3], 4294959104 }
  0x26   :  { %2349 = dma.done.wait [#allocation6], 4096  }
  0x27   :  { %2350 = vsyncadd [#allocation6], 4294963200  ;;  %v2359_v0 = vmov 0   ;;  %v2096_v1 = vld [vmem:[%s2993_s1 + $0x4] ss:$8 sps:$4 sm:$0xff]   ;;  %vm137_vm0 = vcmask 1044480  }
  0x28   :  { %176 = vmatprep.mubr.bf16.mxu0 %v2359_v0  ;;  %v2098_v2 = vld [vmem:[%s2993_s1] ss:$8 sps:$4 sm:$0xff]   ;;  %144 = vmatprep.subr.bf16.mxu0 %v2096_v1  ;;  %v2099_v3 = vld [vmem:[%s2993_s1 + $0x14] ss:$8 sps:$4 sm:$0xff]   ;;  %v2101_v4 = vld [vmem:[%s2993_s1 + $0x10] ss:$8 sps:$4 sm:$0xff]  }
  0x29   :  { %145 = vmatpush1.bf16.msra.mxu0 %v2098_v2  ;;  %v2102_v5 = vld [vmem:[%s2993_s1 + $0x24] ss:$8 sps:$4 sm:$0x1f]   ;;  %v2104_v6 = vld [vmem:[%s2993_s1 + $0x20] ss:$8 sps:$4 sm:$0x1f]  }
  0x2a   :  { %146 = vmatprep.subr.bf16.mxu0 %v2099_v3  ;;  %v139_v7 = vsel %vm137_vm0, %v2104_v6, 0  ;;  %v2105_v8 = vld [vmem:[%s2992_s0] sm:$0xff]   ;;  %vm124_vm1 = vcmask 343040   ;;  %v2106_v9 = vld [vmem:[%s2992_s0 + $0x8] sm:$0xff]   ;;  %v2107_v10 = vld [vmem:[%s2992_s0 + $0x10] sm:$0xff]  }
  0x2b   :  { %v2108_v11 = vld [vmem:[%s2992_s0 + $0x18] sm:$0xff]   ;;  %v2109_v12 = vld [vmem:[#allocation2 + $0x4] ss:$16 sps:$4 sm:$0xff]   ;;  %v2114_v15 = vld [vmem:[#allocation2] ss:$16 sps:$4 sm:$0xff]  }
  0x2c   :  { %v2113_v13 = vld [vmem:[#allocation2 + $0xc] ss:$16 sps:$4 sm:$0xff]   ;;  %v2111_v14 = vld [vmem:[#allocation2 + $0x8] ss:$16 sps:$4 sm:$0xff]   ;;  %793 = vmatprep.subr.bf16.mxu1 %v2109_v12  ;;  %v2115_v16 = vld [vmem:[#allocation2 + $0x24] ss:$16 sps:$4 sm:$0xff]  }
  0x2d   :  { %147 = vmatpush1.bf16.msra.mxu0 %v2101_v4  ;;  %794 = vmatpush1.bf16.msra.mxu1 %v2114_v15  ;;  %v2119_v17 = vld [vmem:[#allocation2 + $0x2c] ss:$16 sps:$4 sm:$0xff]   ;;  %v2117_v18 = vld [vmem:[#allocation2 + $0x28] ss:$16 sps:$4 sm:$0xff]   ;;  %v2120_v19 = vld [vmem:[#allocation2 + $0x20] ss:$16 sps:$4 sm:$0xff]  }
  0x2e   :  { %1866 = vmatprep.subr.msk.bf16.mxu0 %vm137_vm0, %v2102_v5  ;;  %795 = vmatprep.subr.bf16.mxu1 %v2115_v16  ;;  %v2121_v20 = vld [vmem:[#allocation2 + $0x44] ss:$16 sps:$4 sm:$0xff]   ;;  %v2125_v21 = vld [vmem:[#allocation2 + $0x4c] ss:$16 sps:$4 sm:$0xff]   ;;  %v2123_v22 = vld [vmem:[#allocation2 + $0x48] ss:$16 sps:$4 sm:$0xff]  }
  0x2f   :  { %v2126_v23 = vld [vmem:[#allocation2 + $0x40] ss:$16 sps:$4 sm:$0xff]   ;;  %v2127_v24 = vld [vmem:[#allocation2 + $0x64] ss:$16 sps:$4 sm:$0xff]   ;;  %v2131_v25 = vld [vmem:[#allocation2 + $0x6c] ss:$16 sps:$4 sm:$0xff]  }
  0x30   :  { %v2129_v26 = vld [vmem:[#allocation2 + $0x68] ss:$16 sps:$4 sm:$0xff]   ;;  %v2132_v27 = vld [vmem:[#allocation2 + $0x60] ss:$16 sps:$4 sm:$0xff]   ;;  %v2133_v28 = vld [vmem:[#allocation2 + $0x84] ss:$16 sps:$4 sm:$0xff]  }
  0x31   :  { %149 = vmatpush1.bf16.msra.mxu0 %v139_v7  ;;  %796 = vmatpush1.bf16.msra.mxu1 %v2120_v19  ;;  %v2137_v29 = vld [vmem:[#allocation2 + $0x8c] ss:$16 sps:$4 sm:$0xff]   ;;  %v2135_v30 = vld [vmem:[#allocation2 + $0x88] ss:$16 sps:$4 sm:$0xff]   ;;  %v2138_v31 = vld [vmem:[#allocation2 + $0x80] ss:$16 sps:$4 sm:$0xff]  }
  0x32   :  { %866 = vmatprep.subr.bf16.mxu0 %v2113_v13  ;;  %797 = vmatprep.subr.bf16.mxu1 %v2121_v20  ;;  %v2139_v32 = vld [vmem:[#allocation2 + $0xa4] ss:$16 sps:$4 sm:$0xff]   ;;  %v2143_v33 = vld [vmem:[#allocation2 + $0xac] ss:$16 sps:$4 sm:$0xff]   ;;  %v2141_v34 = vld [vmem:[#allocation2 + $0xa8] ss:$16 sps:$4 sm:$0xff]  }
  0x33   :  { %v2144_v35 = vld [vmem:[#allocation2 + $0xa0] ss:$16 sps:$4 sm:$0xff]   ;;  %v2145_v36 = vld [vmem:[#allocation2 + $0xc4] ss:$16 sps:$4 sm:$0xff]   ;;  %v2149_v37 = vld [vmem:[#allocation2 + $0xcc] ss:$16 sps:$4 sm:$0xff]  }
  0x34   :  { %1867 = vmatmul.mubr.msk.bf16.vlgmr.msra.gmra.mrb[0].mxu0 %vm124_vm1, %v2105_v8  ;;  %v2147_v38 = vld [vmem:[#allocation2 + $0xc8] ss:$16 sps:$4 sm:$0xff]   ;;  %v2150_v39 = vld [vmem:[#allocation2 + $0xc0] ss:$16 sps:$4 sm:$0xff]   ;;  %v2151_v40 = vld [vmem:[#allocation2 + $0xe4] ss:$16 sps:$4 sm:$0xff]  }
  0x35   :  { %186 = vmatprep.mubr.bf16.mxu0 %v2359_v0  ;;  %867 = vmatpush1.bf16.msra.mxu0 %v2111_v14  ;;  %v2155_v41 = vld [vmem:[#allocation2 + $0xec] ss:$16 sps:$4 sm:$0xff]   ;;  %v2153_v42 = vld [vmem:[#allocation2 + $0xe8] ss:$16 sps:$4 sm:$0xff]   ;;  %v2156_v43 = vld [vmem:[#allocation2 + $0xe0] ss:$16 sps:$4 sm:$0xff]  }
  0x36   :  { %868 = vmatprep.subr.bf16.mxu0 %v2119_v17  ;;  %798 = vmatpush1.bf16.msra.mxu1 %v2126_v23  ;;  %v2157_v44 = vld [vmem:[#allocation2 + $0x104] ss:$16 sps:$4 sm:$0xff]   ;;  %v2161_v45 = vld [vmem:[#allocation2 + $0x10c] ss:$16 sps:$4 sm:$0xff]   ;;  %v2159_v46 = vld [vmem:[#allocation2 + $0x108] ss:$16 sps:$4 sm:$0xff]  }
  0x37   :  { %799 = vmatprep.subr.bf16.mxu1 %v2127_v24  ;;  %v2162_v47 = vld [vmem:[#allocation2 + $0x100] ss:$16 sps:$4 sm:$0xff]   ;;  %v2163_v48 = vld [vmem:[#allocation2 + $0x124] ss:$16 sps:$4 sm:$0xff]   ;;  %v2167_v49 = vld [vmem:[#allocation2 + $0x12c] ss:$16 sps:$4 sm:$0xff]  }
  0x38   :  { %v2165_v50 = vld [vmem:[#allocation2 + $0x128] ss:$16 sps:$4 sm:$0xff]   ;;  %v2168_v51 = vld [vmem:[#allocation2 + $0x120] ss:$16 sps:$4 sm:$0xff]   ;;  %v2169_v52 = vld [vmem:[#allocation2 + $0x144] ss:$16 sps:$4 sm:$0xff]  }
  0x39   :  { %869 = vmatpush1.bf16.msra.mxu0 %v2117_v18  ;;  %v2173_v53 = vld [vmem:[#allocation2 + $0x14c] ss:$16 sps:$4 sm:$0xff]   ;;  %v2171_v54 = vld [vmem:[#allocation2 + $0x148] ss:$16 sps:$4 sm:$0xff]   ;;  %v2174_v55 = vld [vmem:[#allocation2 + $0x140] ss:$16 sps:$4 sm:$0xff]  }
  0x3a   :  { %870 = vmatprep.subr.bf16.mxu0 %v2125_v21  ;;  %800 = vmatpush1.bf16.msra.mxu1 %v2132_v27  ;;  %v2175_v56 = vld [vmem:[#allocation2 + $0x164] ss:$16 sps:$4 sm:$0xff]   ;;  %v2179_v57 = vld [vmem:[#allocation2 + $0x16c] ss:$16 sps:$4 sm:$0xff]   ;;  %v2177_v58 = vld [vmem:[#allocation2 + $0x168] ss:$16 sps:$4 sm:$0xff]  }
  0x3b   :  { %801 = vmatprep.subr.bf16.mxu1 %v2133_v28  ;;  %v2180_v59 = vld [vmem:[#allocation2 + $0x160] ss:$16 sps:$4 sm:$0xff]   ;;  %v2181_v60 = vld [vmem:[#allocation2 + $0x184] ss:$16 sps:$4 sm:$0xff]   ;;  %v2185_v61 = vld [vmem:[#allocation2 + $0x18c] ss:$16 sps:$4 sm:$0xff]  }
  0x3c   :  { %1868 = vmatmul.mubr.msk.bf16.gmra.mrb[4].mxu0 %vm124_vm1, %v2106_v9  ;;  %v2183_v62 = vld [vmem:[#allocation2 + $0x188] ss:$16 sps:$4 sm:$0xff]   ;;  %v2186_v63 = vld [vmem:[#allocation2 + $0x180] ss:$16 sps:$4 sm:$0xff]   ;;  %v2191_v1 = vld [vmem:[#allocation2 + $0x1ac] ss:$16 sps:$4 sm:$0xff]  }
  0x3d   :  { %196 = vmatprep.mubr.bf16.mxu0 %v2359_v0  ;;  %871 = vmatpush1.bf16.msra.mxu0 %v2123_v22  ;;  %v2189_v2 = vld [vmem:[#allocation2 + $0x1a8] ss:$16 sps:$4 sm:$0xff]   ;;  %v2192_v3 = vld [vmem:[#allocation2 + $0x1a0] ss:$16 sps:$4 sm:$0xff]   ;;  %v2193_v4 = vld [vmem:[#allocation2 + $0x1c4] ss:$16 sps:$4 sm:$0xff]  }
  0x3e   :  { %872 = vmatprep.subr.bf16.mxu0 %v2131_v25  ;;  %802 = vmatpush1.bf16.msra.mxu1 %v2138_v31  ;;  %v2197_v5 = vld [vmem:[#allocation2 + $0x1cc] ss:$16 sps:$4 sm:$0xff]   ;;  %v2195_v6 = vld [vmem:[#allocation2 + $0x1c8] ss:$16 sps:$4 sm:$0xff]   ;;  %v2198_v7 = vld [vmem:[#allocation2 + $0x1c0] ss:$16 sps:$4 sm:$0xff]  }
  0x3f   :  { %803 = vmatprep.subr.bf16.mxu1 %v2139_v32  ;;  %v2199_v8 = vld [vmem:[#allocation2 + $0x1e4] ss:$16 sps:$4 sm:$0xff]   ;;  %v2203_v9 = vld [vmem:[#allocation2 + $0x1ec] ss:$16 sps:$4 sm:$0xff]  }
  0x41   :  { %873 = vmatpush1.bf16.msra.mxu0 %v2129_v26 }
  0x42   :  { %874 = vmatprep.subr.bf16.mxu0 %v2137_v29  ;;  %804 = vmatpush1.bf16.msra.mxu1 %v2144_v35 }
  0x43   :  { %805 = vmatprep.subr.bf16.mxu1 %v2145_v36 }
  0x44   :  { %1869 = vmatmul.mubr.msk.bf16.gmra.mrb[8].mxu0 %vm124_vm1, %v2107_v10  ;;  %v2201_v10 = vld [vmem:[#allocation2 + $0x1e8] ss:$16 sps:$4 sm:$0xff]  }
  0x45   :  { %206 = vmatprep.mubr.bf16.mxu0 %v2359_v0  ;;  %875 = vmatpush1.bf16.msra.mxu0 %v2135_v30  ;;  %v2187_v0 = vld [vmem:[#allocation2 + $0x1a4] ss:$16 sps:$4 sm:$0xff]  }
  0x46   :  { %876 = vmatprep.subr.bf16.mxu0 %v2143_v33  ;;  %806 = vmatpush1.bf16.msra.mxu1 %v2150_v39 }
  0x47   :  { %807 = vmatprep.subr.bf16.mxu1 %v2151_v40 }
  0x49   :  { %877 = vmatpush1.bf16.msra.mxu0 %v2141_v34 }
  0x4a   :  { %878 = vmatprep.subr.bf16.mxu0 %v2149_v37  ;;  %808 = vmatpush1.bf16.msra.mxu1 %v2156_v43 }
  0x4b   :  { %809 = vmatprep.subr.bf16.mxu1 %v2157_v44 }
  0x4c   :  { %1870 = vmatmul.mubr.msk.bf16.gmra.mrb[12].mxu0 %vm124_vm1, %v2108_v11  ;;  %v2204_v11 = vld [vmem:[#allocation2 + $0x1e0] ss:$16 sps:$4 sm:$0xff]  }
  0x4d   :  { %879 = vmatpush1.bf16.msra.mxu0 %v2147_v38 }
  0x4e   :  { %880 = vmatprep.subr.bf16.mxu0 %v2155_v41  ;;  %810 = vmatpush1.bf16.msra.mxu1 %v2162_v47 }
  0x4f   :  { %811 = vmatprep.subr.bf16.mxu1 %v2163_v48 }
  0x51   :  { %881 = vmatpush1.bf16.msra.mxu0 %v2153_v42 }
  0x52   :  { %882 = vmatprep.subr.bf16.mxu0 %v2161_v45  ;;  %812 = vmatpush1.bf16.msra.mxu1 %v2168_v51 }
  0x53   :  { %813 = vmatprep.subr.bf16.mxu1 %v2169_v52 }
  0x55   :  { %883 = vmatpush1.bf16.msra.mxu0 %v2159_v46 }
  0x56   :  { %884 = vmatprep.subr.bf16.mxu0 %v2167_v49  ;;  %814 = vmatpush1.bf16.msra.mxu1 %v2174_v55 }
  0x57   :  { %815 = vmatprep.subr.bf16.mxu1 %v2175_v56 }
  0x59   :  { %885 = vmatpush1.bf16.msra.mxu0 %v2165_v50 }
  0x5a   :  { %886 = vmatprep.subr.bf16.mxu0 %v2173_v53  ;;  %816 = vmatpush1.bf16.msra.mxu1 %v2180_v59 }
  0x5b   :  { %817 = vmatprep.subr.bf16.mxu1 %v2181_v60 }
  0x5d   :  { %887 = vmatpush1.bf16.msra.mxu0 %v2171_v54 }
  0x5e   :  { %888 = vmatprep.subr.bf16.mxu0 %v2179_v57  ;;  %818 = vmatpush1.bf16.msra.mxu1 %v2186_v63 }
  0x5f   :  { %819 = vmatprep.subr.bf16.mxu1 %v2187_v0 }
  0x61   :  { %889 = vmatpush1.bf16.msra.mxu0 %v2177_v58 }
  0x62   :  { %890 = vmatprep.subr.bf16.mxu0 %v2185_v61  ;;  %820 = vmatpush1.bf16.msra.mxu1 %v2192_v3 }
  0x63   :  { %821 = vmatprep.subr.bf16.mxu1 %v2193_v4 }
  0x65   :  { %891 = vmatpush1.bf16.msra.mxu0 %v2183_v62 }
  0x66   :  { %892 = vmatprep.subr.bf16.mxu0 %v2191_v1  ;;  %822 = vmatpush1.bf16.msra.mxu1 %v2198_v7 }
  0x67   :  { %823 = vmatprep.subr.bf16.mxu1 %v2199_v8 }
  0x69   :  { %893 = vmatpush1.bf16.msra.mxu0 %v2189_v2 }
  0x6a   :  { %894 = vmatprep.subr.bf16.mxu0 %v2197_v5  ;;  %824 = vmatpush1.bf16.msra.mxu1 %v2204_v11 }
  0x6d   :  { %895 = vmatpush1.bf16.msra.mxu0 %v2195_v6 }
  0x6e   :  { %896 = vmatprep.subr.bf16.mxu0 %v2203_v9 }
  0x71   :  { %897 = vmatpush1.bf16.msra.mxu0 %v2201_v10 }
 0x107   :  { %v178_v12 = vpop.f32.mrb[0].mxu0 }
 0x108   :  { %v180_v13 = vpop.f32.mrb[1].mxu0 }
 0x109   :  { %v182_v14 = vpop.f32.mrb[2].mxu0 }
 0x10a   :  { %v217_v15 = vadd.f32 %v182_v14, %v178_v12  ;;  %v184_v16 = vpop.f32.mrb[3].mxu0 }
 0x10b   :  { %v230_v17 = vadd.f32 %v184_v16, %v180_v13 }
 0x10f   :  { %v188_v18 = vpop.f32.mrb[4].mxu0 }
 0x110   :  { %v218_v19 = vadd.f32 %v217_v15, %v188_v18  ;;  %v190_v20 = vpop.f32.mrb[5].mxu0 }
 0x111   :  { %v231_v21 = vadd.f32 %v230_v17, %v190_v20  ;;  %v192_v22 = vpop.f32.mrb[6].mxu0 }
 0x112   :  { %v219_v23 = vadd.f32 %v218_v19, %v192_v22  ;;  %v194_v24 = vpop.f32.mrb[7].mxu0 }
 0x113   :  { %v232_v25 = vadd.f32 %v231_v21, %v194_v24 }
 0x117   :  { %v198_v26 = vpop.f32.mrb[8].mxu0 }
 0x118   :  { %v220_v27 = vadd.f32 %v219_v23, %v198_v26  ;;  %v200_v28 = vpop.f32.mrb[9].mxu0 }
 0x119   :  { %v233_v29 = vadd.f32 %v232_v25, %v200_v28  ;;  %v202_v30 = vpop.f32.mrb[10].mxu0 }
 0x11a   :  { %v221_v31 = vadd.f32 %v220_v27, %v202_v30  ;;  %v204_v32 = vpop.f32.mrb[11].mxu0 }
 0x11b   :  { %v234_v33 = vadd.f32 %v233_v29, %v204_v32 }
 0x11f   :  { %v208_v34 = vpop.f32.mrb[12].mxu0 }
 0x120   :  { %v222_v35 = vadd.f32 %v221_v31, %v208_v34  ;;  %v210_v36 = vpop.f32.mrb[13].mxu0 }
 0x121   :  { %v235_v37 = vadd.f32 %v234_v33, %v210_v36  ;;  %v212_v38 = vpop.f32.mrb[14].mxu0 }
 0x122   :  { %v223_v39 = vadd.f32 %v222_v35, %v212_v38  ;;  %v214_v40 = vpop.f32.mrb[15].mxu0 }
 0x123   :  { %v236_v41 = vadd.f32 %v235_v37, %v214_v40 }
 0x124   :  { %v224_v42 = vrot.slane %v223_v39, 4 }
 0x125   :  { %v237_v43 = vrot.slane %v236_v41, 4 }
 0x126   :  { %v225_v44 = vadd.f32 %v224_v42, %v223_v39 }
 0x127   :  { %v238_v45 = vadd.f32 %v237_v43, %v236_v41 }
 0x128   :  { %v226_v46 = vrot.slane %v225_v44, 2 }
 0x129   :  { %v239_v47 = vrot.slane %v238_v45, 2 }
 0x12a   :  { %v227_v48 = vadd.f32 %v226_v46, %v225_v44 }
 0x12b   :  { %v240_v49 = vadd.f32 %v239_v47, %v238_v45 }
 0x12c   :  { %v228_v50 = vrot.slane %v227_v48, 1 }
 0x12d   :  { %v241_v51 = vrot.slane %v240_v49, 1 }
 0x12e   :  { %v229_v52 = vadd.f32 %v228_v50, %v227_v48 }
 0x12f   :  { %v242_v53 = vadd.f32 %v241_v51, %v240_v49 }
 0x130   :  { %v244_v54 = vmul.f32 0.015625, %v229_v52 }
 0x131   :  { %v245_v55 = vmul.f32 0.015625, %v242_v53 }
 0x132   :  { %v2469_v56 = vsub.f32 %v178_v12, %v244_v54  ;;  %v2471_v57 = vsub.f32 %v182_v14, %v244_v54  ;;  %v2473_v58 = vsub.f32 %v188_v18, %v244_v54  ;;  %v2475_v59 = vsub.f32 %v192_v22, %v244_v54 }
 0x133   :  { %v2477_v60 = vsub.f32 %v198_v26, %v244_v54  ;;  %v2479_v61 = vsub.f32 %v202_v30, %v244_v54  ;;  %v2481_v62 = vsub.f32 %v208_v34, %v244_v54  ;;  %v2483_v63 = vsub.f32 %v212_v38, %v244_v54 }
 0x134   :  { %v262_v0 = vmul.f32 %v2469_v56, %v2469_v56  ;;  %v264_v1 = vmul.f32 %v2471_v57, %v2471_v57  ;;  %v266_v2 = vmul.f32 %v2473_v58, %v2473_v58  ;;  %v268_v3 = vmul.f32 %v2475_v59, %v2475_v59 }
 0x135   :  { %v2493_v5 = vsub.f32 %v180_v13, %v245_v55  ;;  %v2495_v6 = vsub.f32 %v184_v16, %v245_v55  ;;  %v2497_v7 = vsub.f32 %v190_v20, %v245_v55  ;;  %v2499_v8 = vsub.f32 %v194_v24, %v245_v55 }
 0x136   :  { %v278_v4 = vadd.f32 %v264_v1, %v262_v0  ;;  %v2501_v9 = vsub.f32 %v200_v28, %v245_v55  ;;  %v2503_v10 = vsub.f32 %v204_v32, %v245_v55  ;;  %v2505_v11 = vsub.f32 %v210_v36, %v245_v55 }
 0x137   :  { %v2507_v14 = vsub.f32 %v214_v40, %v245_v55  ;;  %v263_v15 = vmul.f32 %v2493_v5, %v2493_v5  ;;  %v265_v13 = vmul.f32 %v2495_v6, %v2495_v6  ;;  %v270_v16 = vmul.f32 %v2477_v60, %v2477_v60 }
 0x138   :  { %v279_v12 = vadd.f32 %v278_v4, %v266_v2  ;;  %v267_v18 = vmul.f32 %v2497_v7, %v2497_v7  ;;  %v272_v20 = vmul.f32 %v2479_v61, %v2479_v61  ;;  %v269_v22 = vmul.f32 %v2499_v8, %v2499_v8 }
 0x139   :  { %v291_v19 = vadd.f32 %v265_v13, %v263_v15  ;;  %v274_v24 = vmul.f32 %v2481_v62, %v2481_v62  ;;  %v271_v26 = vmul.f32 %v2501_v9, %v2501_v9  ;;  %v276_v28 = vmul.f32 %v2483_v63, %v2483_v63 }
 0x13a   :  { %v280_v17 = vadd.f32 %v279_v12, %v268_v3  ;;  %v273_v30 = vmul.f32 %v2503_v10, %v2503_v10  ;;  %v275_v33 = vmul.f32 %v2505_v11, %v2505_v11  ;;  %v277_v36 = vmul.f32 %v2507_v14, %v2507_v14 }
 0x13b   :  { %v292_v23 = vadd.f32 %v291_v19, %v267_v18  ;;  %v2360_v54 = vmov 1966171168   ;;  %v317_v0 = vlaneseq }
 0x13c   :  { %v281_v21 = vadd.f32 %v280_v17, %v270_v16  ;;  %v315_v55 = vunpack.c.l.s4 %v2360_v54  ;;  %v306_v16 = vld [vmem:[%s2994_s2] sm:$0x3] }
 0x13d   :  { %v293_v27 = vadd.f32 %v292_v23, %v269_v22  ;;  %v2533_v2 = vshrl.u32 %v317_v0, 7 }
 0x13e   :  { %v282_v25 = vadd.f32 %v281_v21, %v272_v20  ;;  %v316_v1 = vunpack.c.0.s8 %v315_v55  ;;  %v357_v20 = vld [vmem:[%s2995_s3] sm:$0x3] }
 0x13f   :  { %v294_v31 = vadd.f32 %v293_v27, %v271_v26  ;;  %v2544_v18 = vsub.s32 0, %v2533_v2  ;;  %v2547_v19 = vsub.s32 1, %v2533_v2 }
 0x140   :  { %v283_v29 = vadd.f32 %v282_v25, %v274_v24  ;;  %v2536_v4 = vsub.s32 %v316_v1, %v2533_v2 }
 0x141   :  { %v295_v34 = vadd.f32 %v294_v31, %v273_v30  ;;  %v366_v24 = vrot.slane %v357_v20, %v2547_v19  ;;  %v2558_v25 = vrot.slane %v357_v20, %v2544_v18 }
 0x142   :  { %v284_v32 = vadd.f32 %v283_v29, %v276_v28 }
 0x143   :  { %v296_v37 = vadd.f32 %v295_v34, %v275_v33 }
 0x144   :  { %v285_v35 = vrot.slane %v284_v32, 4 }
 0x145   :  { %v297_v39 = vadd.f32 %v296_v37, %v277_v36 }
 0x146   :  { %v286_v38 = vadd.f32 %v285_v35, %v284_v32 }
 0x147   :  { %v298_v41 = vrot.slane %v297_v39, 4 }
 0x148   :  { %v287_v40 = vrot.slane %v286_v38, 2 }
 0x149   :  { %v299_v43 = vadd.f32 %v298_v41, %v297_v39 }
 0x14a   :  { %v288_v42 = vadd.f32 %v287_v40, %v286_v38 }
 0x14b   :  { %v300_v45 = vrot.slane %v299_v43, 2 }
 0x14c   :  { %v289_v44 = vrot.slane %v288_v42, 1 }
 0x14d   :  { %v301_v47 = vadd.f32 %v300_v45, %v299_v43 }
 0x14e   :  { %v290_v46 = vadd.f32 %v289_v44, %v288_v42 }
 0x14f   :  { %v302_v49 = vrot.slane %v301_v47, 1 }
 0x150   :  { %v304_v48 = vmul.f32 0.015625, %v290_v46 }
 0x151   :  { %v303_v51 = vadd.f32 %v302_v49, %v301_v47 }
 0x152   :  { %v307_v50 = vadd.f32 1e-05, %v304_v48 }
 0x153   :  { %v305_v52 = vmul.f32 0.015625, %v303_v51 }
 0x154   :  { %2237 = vrsqrt.f32 %v307_v50 }
 0x155   :  { %v308_v53 = vadd.f32 1e-05, %v305_v52 }
 0x157   :  { %2239 = vrsqrt.f32 %v308_v53 }
 0x15e   :  { %v2238_v3 = vpop.eup %2237 }
 0x161   :  { %v2240_v12 = vpop.eup %2239 }
 0x162   :  { %v313_v15 = vcombine.low %v2238_v3, %v2240_v12 }
 0x164   :  { %v320_v13 = vrot.slane %v313_v15, %v2536_v4 }
 0x166   :  { %v327_v17 = vrot.slane %v320_v13, %v2536_v4 }
 0x168   :  { %v329_v21 = vmul.f32 %v327_v17, %v306_v16 }
 0x16a   :  { %v2553_v22 = vrot.slane %v329_v21, %v2544_v18  ;;  %v338_v23 = vrot.slane %v329_v21, %v2547_v19 }
 0x16c   :  { %v356_v26 = vmul.f32 %v338_v23, %v2507_v14  ;;  %v342_v27 = vmul.f32 %v338_v23, %v2493_v5  ;;  %v344_v28 = vmul.f32 %v338_v23, %v2495_v6  ;;  %v341_v29 = vmul.f32 %v2553_v22, %v2469_v56 }
 0x16d   :  { %v343_v30 = vmul.f32 %v2553_v22, %v2471_v57  ;;  %v346_v31 = vmul.f32 %v338_v23, %v2497_v7  ;;  %v348_v32 = vmul.f32 %v338_v23, %v2499_v8  ;;  %v345_v33 = vmul.f32 %v2553_v22, %v2473_v58 }
 0x16e   :  { %v384_v34 = vadd.f32 %v366_v24, %v356_v26  ;;  %v370_v35 = vadd.f32 %v366_v24, %v342_v27  ;;  %v372_v14 = vadd.f32 %v366_v24, %v344_v28  ;;  %v369_v5 = vadd.f32 %v2558_v25, %v341_v29  ;;  %v2205_v26 = vld [vmem:[#allocation5 + $0x40] sm:$0xff]   ;;  %v2212_v29 = vld [vmem:[#allocation5 + $0x88] sm:$0xff]  }
 0x16f   :  { %v371_v6 = vadd.f32 %v2558_v25, %v343_v30  ;;  %v374_v36 = vadd.f32 %v366_v24, %v346_v31  ;;  %v376_v37 = vadd.f32 %v366_v24, %v348_v32  ;;  %v347_v56 = vmul.f32 %v2553_v22, %v2475_v59  ;;  %v2207_v27 = vld [vmem:[#allocation5 + $0xc0] sm:$0xff]   ;;  %2007 = vmatprep.subr.bf16.mxu1 %v2205_v26  ;;  %v2213_v30 = vld [vmem:[#allocation5 + $0x50] sm:$0xff]  }
 0x170   :  { %v386_v57 = vmax.f32 %v370_v35, 0.0  ;;  %v388_v38 = vmax.f32 %v372_v14, 0.0  ;;  %v385_v7 = vmax.f32 %v369_v5, 0.0  ;;  %v373_v8 = vadd.f32 %v2558_v25, %v345_v33  ;;  %v2206_v28 = vld [vmem:[#allocation5] sm:$0xff]   ;;  %2047 = vmatprep.subr.bf16.mxu0 %v2207_v27  ;;  %v2215_v31 = vld [vmem:[#allocation5 + $0xd0] sm:$0xff]   ;;  %v2219_v35 = vld [vmem:[#allocation5 + $0xd8] sm:$0xff]  }
 0x171   :  { %v387_v39 = vmax.f32 %v371_v6, 0.0  ;;  %v390_v40 = vmax.f32 %v374_v36, 0.0  ;;  %v392_v58 = vmax.f32 %v376_v37, 0.0  ;;  %v375_v41 = vadd.f32 %v2558_v25, %v347_v56  ;;  %v2214_v32 = vld [vmem:[#allocation5 + $0x10] sm:$0xff]   ;;  %v2218_v14 = vld [vmem:[#allocation5 + $0x18] sm:$0xff]   ;;  %v2221_v6 = vld [vmem:[#allocation5 + $0x60] sm:$0xff]  }
 0x172   :  { %v402_v42 = vpack.c.bf16 %v388_v38, %v386_v57  ;;  %v389_v43 = vmax.f32 %v373_v8, 0.0  ;;  %v350_v44 = vmul.f32 %v338_v23, %v2501_v9  ;;  %v352_v45 = vmul.f32 %v338_v23, %v2503_v10  ;;  %v2216_v33 = vld [vmem:[#allocation5 + $0x90] sm:$0xff]   ;;  %v2220_v5 = vld [vmem:[#allocation5 + $0x98] sm:$0xff]   ;;  %v2223_v36 = vld [vmem:[#allocation5 + $0xe0] sm:$0xff]  }
 0x173   :  { %v401_v46 = vpack.c.bf16 %v387_v39, %v385_v7  ;;  %v404_v47 = vpack.c.bf16 %v392_v58, %v390_v40  ;;  %v391_v48 = vmax.f32 %v375_v41, 0.0  ;;  %v349_v59 = vmul.f32 %v2553_v22, %v2477_v60  ;;  %v2222_v37 = vld [vmem:[#allocation5 + $0x20] sm:$0xff]   ;;  %v2225_v57 = vld [vmem:[#allocation5 + $0x68] sm:$0xff]   ;;  %v2229_v39 = vld [vmem:[#allocation5 + $0x70] sm:$0xff]  }
 0x174   :  { %825 = vmatprep.mubr.bf16.mxu1 %v402_v42  ;;  %898 = vmatprep.mubr.bf16.mxu0 %v402_v42  ;;  %v378_v49 = vadd.f32 %v366_v24, %v350_v44  ;;  %v380_v50 = vadd.f32 %v366_v24, %v352_v45  ;;  %v351_v51 = vmul.f32 %v2553_v22, %v2479_v61  ;;  %v400_v1 = vmax.f32 %v384_v34, 0.0  ;;  %v2217_v34 = vld [vmem:[#allocation5 + $0x58] sm:$0xff]   ;;  %v2224_v56 = vld [vmem:[#allocation5 + $0xa0] sm:$0xff]   ;;  %v2227_v38 = vld [vmem:[#allocation5 + $0xe8] sm:$0xff]  }
 0x175   :  { %826 = vmatmul.mubr.bf16.vlgmr.msra.gmra.mrb[0].mxu1 %v401_v46  ;;  %899 = vmatmul.mubr.bf16.vlgmr.msra.gmra.mrb[16].mxu0 %v401_v46  ;;  %v403_v52 = vpack.c.bf16 %v391_v48, %v389_v43  ;;  %v377_v9 = vadd.f32 %v2558_v25, %v349_v59  ;;  %v354_v10 = vmul.f32 %v338_v23, %v2505_v11  ;;  %v2226_v7 = vld [vmem:[#allocation5 + $0x28] sm:$0xff]   ;;  %v2231_v40 = vld [vmem:[#allocation5 + $0xf0] sm:$0xff]   ;;  %v2233_v42 = vld [vmem:[#allocation5 + $0x78] sm:$0xff]  }
 0x176   :  { %835 = vmatprep.mubr.bf16.mxu1 %v404_v47  ;;  %908 = vmatprep.mubr.bf16.mxu0 %v404_v47  ;;  %v394_v53 = vmax.f32 %v378_v49, 0.0  ;;  %v396_v54 = vmax.f32 %v380_v50, 0.0  ;;  %v379_v60 = vadd.f32 %v2558_v25, %v351_v51  ;;  %v353_v11 = vmul.f32 %v2553_v22, %v2481_v62  ;;  %v2208_v62 = vld [vmem:[#allocation5 + $0x80] sm:$0xff]   ;;  %v2228_v8 = vld [vmem:[#allocation5 + $0xa8] sm:$0xff]   ;;  %v2230_v58 = vld [vmem:[#allocation5 + $0x30] sm:$0xff]  }
 0x177   :  { %v393_v55 = vmax.f32 %v377_v9, 0.0  ;;  %v382_v0 = vadd.f32 %v366_v24, %v354_v10  ;;  %v355_v16 = vmul.f32 %v2553_v22, %v2483_v63  ;;  %2008 = vmatpush3.bf16.msra.mxu1 %v2206_v28  ;;  %2048 = vmatpush3.bf16.msra.mxu0 %v2208_v62  ;;  %v2209_v63 = vld [vmem:[#allocation5 + $0x48] sm:$0xff]   ;;  %v2232_v41 = vld [vmem:[#allocation5 + $0xb0] sm:$0xff]   ;;  %v2235_v43 = vld [vmem:[#allocation5 + $0xf8] sm:$0xff]  }
 0x178   :  { %v406_v3 = vpack.c.bf16 %v396_v54, %v394_v53  ;;  %v395_v12 = vmax.f32 %v379_v60, 0.0  ;;  %v381_v17 = vadd.f32 %v2558_v25, %v353_v11  ;;  %v2211_v22 = vld [vmem:[#allocation5 + $0xc8] sm:$0xff]   ;;  %2009 = vmatprep.subr.bf16.mxu1 %v2209_v63  ;;  %v2234_v44 = vld [vmem:[#allocation5 + $0x38] sm:$0xff]  }
 0x179   :  { %v398_v15 = vmax.f32 %v382_v0, 0.0  ;;  %v383_v20 = vadd.f32 %v2558_v25, %v355_v16  ;;  %v2210_v25 = vld [vmem:[#allocation5 + $0x8] sm:$0xff]   ;;  %2049 = vmatprep.subr.bf16.mxu0 %v2211_v22  ;;  %v2236_v45 = vld [vmem:[#allocation5 + $0xb8] sm:$0xff]  }
 0x17a   :  { %v405_v61 = vpack.c.bf16 %v395_v12, %v393_v55  ;;  %v397_v21 = vmax.f32 %v381_v17, 0.0 }
 0x17b   :  { %v408_v13 = vpack.c.bf16 %v400_v1, %v398_v15  ;;  %v399_v23 = vmax.f32 %v383_v20, 0.0  ;;  %2010 = vmatpush3.bf16.msra.mxu1 %v2210_v25  ;;  %2050 = vmatpush3.bf16.msra.mxu0 %v2212_v29 }
 0x17c   :  { %2011 = vmatprep.subr.bf16.mxu1 %v2213_v30  ;;  %2051 = vmatprep.subr.bf16.mxu0 %v2215_v31 }
 0x17d   :  { %836 = vmatmul.mubr.bf16.gmra.mrb[4].mxu1 %v403_v52  ;;  %909 = vmatmul.mubr.bf16.gmra.mrb[20].mxu0 %v403_v52  ;;  %v407_v24 = vpack.c.bf16 %v399_v23, %v397_v21 }
 0x17e   :  { %845 = vmatprep.mubr.bf16.mxu1 %v406_v3  ;;  %918 = vmatprep.mubr.bf16.mxu0 %v406_v3 }
 0x17f   :  { %2012 = vmatpush3.bf16.msra.mxu1 %v2214_v32  ;;  %2052 = vmatpush3.bf16.msra.mxu0 %v2216_v33 }
 0x180   :  { %2013 = vmatprep.subr.bf16.mxu1 %v2217_v34  ;;  %2053 = vmatprep.subr.bf16.mxu0 %v2219_v35 }
 0x183   :  { %2014 = vmatpush3.bf16.msra.mxu1 %v2218_v14  ;;  %2054 = vmatpush3.bf16.msra.mxu0 %v2220_v5 }
 0x184   :  { %2015 = vmatprep.subr.bf16.mxu1 %v2221_v6  ;;  %2055 = vmatprep.subr.bf16.mxu0 %v2223_v36 }
 0x185   :  { %846 = vmatmul.mubr.bf16.gmra.mrb[8].mxu1 %v405_v61  ;;  %919 = vmatmul.mubr.bf16.gmra.mrb[24].mxu0 %v405_v61 }
 0x186   :  { %855 = vmatprep.mubr.bf16.mxu1 %v408_v13  ;;  %928 = vmatprep.mubr.bf16.mxu0 %v408_v13 }
 0x187   :  { %2016 = vmatpush3.bf16.msra.mxu1 %v2222_v37  ;;  %2056 = vmatpush3.bf16.msra.mxu0 %v2224_v56 }
 0x188   :  { %2017 = vmatprep.subr.bf16.mxu1 %v2225_v57  ;;  %2057 = vmatprep.subr.bf16.mxu0 %v2227_v38 }
 0x18b   :  { %2018 = vmatpush3.bf16.msra.mxu1 %v2226_v7  ;;  %2058 = vmatpush3.bf16.msra.mxu0 %v2228_v8 }
 0x18c   :  { %2019 = vmatprep.subr.bf16.mxu1 %v2229_v39  ;;  %2059 = vmatprep.subr.bf16.mxu0 %v2231_v40 }
 0x18d   :  { %856 = vmatmul.mubr.bf16.gmra.mrb[12].mxu1 %v407_v24  ;;  %929 = vmatmul.mubr.bf16.gmra.mrb[28].mxu0 %v407_v24 }
 0x18f   :  { %2020 = vmatpush3.bf16.msra.mxu1 %v2230_v58  ;;  %2060 = vmatpush3.bf16.msra.mxu0 %v2232_v41 }
 0x190   :  { %2021 = vmatprep.subr.bf16.mxu1 %v2233_v42  ;;  %2061 = vmatprep.subr.bf16.mxu0 %v2235_v43 }
 0x193   :  { %2022 = vmatpush3.bf16.msra.mxu1 %v2234_v44  ;;  %2062 = vmatpush3.bf16.msra.mxu0 %v2236_v45 }
 0x248   :  { %v2592_v46 = vpop.f32.mrb[0].mxu1  ;;  %v2594_v47 = vpop.f32.mrb[16].mxu0 }
 0x249   :  { %v2596_v48 = vpop.f32.mrb[1].mxu1  ;;  %v2598_v59 = vpop.f32.mrb[17].mxu0 }
 0x24a   :  { %v2600_v49 = vpop.f32.mrb[2].mxu1  ;;  %v2602_v50 = vpop.f32.mrb[18].mxu0 }
 0x24b   :  { %v939_v51 = vadd.f32 %v2600_v49, %v2592_v46  ;;  %v965_v52 = vadd.f32 %v2602_v50, %v2594_v47  ;;  %v2608_v9 = vpop.f32.mrb[3].mxu1  ;;  %v2610_v10 = vpop.f32.mrb[19].mxu0 }
 0x24c   :  { %v952_v53 = vadd.f32 %v2608_v9, %v2596_v48  ;;  %v978_v54 = vadd.f32 %v2610_v10, %v2598_v59 }
 0x250   :  { %v2616_v60 = vpop.f32.mrb[4].mxu1  ;;  %v2618_v55 = vpop.f32.mrb[20].mxu0 }
 0x251   :  { %v940_v0 = vadd.f32 %v939_v51, %v2616_v60  ;;  %v966_v1 = vadd.f32 %v965_v52, %v2618_v55  ;;  %v2622_v3 = vpop.f32.mrb[5].mxu1  ;;  %v2624_v12 = vpop.f32.mrb[21].mxu0 }
 0x252   :  { %v953_v15 = vadd.f32 %v952_v53, %v2622_v3  ;;  %v979_v61 = vadd.f32 %v978_v54, %v2624_v12  ;;  %v2628_v13 = vpop.f32.mrb[6].mxu1  ;;  %v2630_v11 = vpop.f32.mrb[22].mxu0 }
 0x253   :  { %v941_v16 = vadd.f32 %v940_v0, %v2628_v13  ;;  %v967_v17 = vadd.f32 %v966_v1, %v2630_v11  ;;  %v2634_v20 = vpop.f32.mrb[7].mxu1  ;;  %v2636_v21 = vpop.f32.mrb[23].mxu0 }
 0x254   :  { %v954_v23 = vadd.f32 %v953_v15, %v2634_v20  ;;  %v980_v24 = vadd.f32 %v979_v61, %v2636_v21 }
 0x258   :  { %v847_v26 = vpop.f32.mrb[8].mxu1  ;;  %v2640_v27 = vpop.f32.mrb[24].mxu0 }
 0x259   :  { %v942_v28 = vadd.f32 %v941_v16, %v847_v26  ;;  %v968_v62 = vadd.f32 %v967_v17, %v2640_v27  ;;  %v2643_v63 = vpop.f32.mrb[9].mxu1  ;;  %v2645_v22 = vpop.f32.mrb[25].mxu0 }
 0x25a   :  { %v955_v25 = vadd.f32 %v954_v23, %v2643_v63  ;;  %v981_v29 = vadd.f32 %v980_v24, %v2645_v22  ;;  %v851_v30 = vpop.f32.mrb[10].mxu1  ;;  %v2649_v31 = vpop.f32.mrb[26].mxu0 }
 0x25b   :  { %v943_v32 = vadd.f32 %v942_v28, %v851_v30  ;;  %v969_v33 = vadd.f32 %v968_v62, %v2649_v31  ;;  %v2652_v34 = vpop.f32.mrb[11].mxu1  ;;  %v2654_v35 = vpop.f32.mrb[27].mxu0 }
 0x25c   :  { %v956_v14 = vadd.f32 %v955_v25, %v2652_v34  ;;  %v982_v5 = vadd.f32 %v981_v29, %v2654_v35 }
 0x260   :  { %v857_v6 = vpop.f32.mrb[12].mxu1  ;;  %v930_v36 = vpop.f32.mrb[28].mxu0 }
 0x261   :  { %v944_v37 = vadd.f32 %v943_v32, %v857_v6  ;;  %v970_v56 = vadd.f32 %v969_v33, %v930_v36  ;;  %v2658_v57 = vpop.f32.mrb[13].mxu1  ;;  %v2660_v38 = vpop.f32.mrb[29].mxu0 }
 0x262   :  { %v957_v7 = vadd.f32 %v956_v14, %v2658_v57  ;;  %v983_v8 = vadd.f32 %v982_v5, %v2660_v38  ;;  %v861_v39 = vpop.f32.mrb[14].mxu1  ;;  %v934_v40 = vpop.f32.mrb[30].mxu0 }
 0x263   :  { %v945_v58 = vadd.f32 %v944_v37, %v861_v39  ;;  %v971_v41 = vadd.f32 %v970_v56, %v934_v40  ;;  %v2664_v42 = vpop.f32.mrb[15].mxu1  ;;  %v2666_v43 = vpop.f32.mrb[31].mxu0 }
 0x264   :  { %v958_v44 = vadd.f32 %v957_v7, %v2664_v42  ;;  %v984_v45 = vadd.f32 %v983_v8, %v2666_v43 }
 0x265   :  { %v946_v51 = vrot.slane %v945_v58, 4  ;;  %v972_v52 = vrot.slane %v971_v41, 4 }
 0x266   :  { %v959_v53 = vrot.slane %v958_v44, 4  ;;  %v985_v54 = vrot.slane %v984_v45, 4 }
 0x267   :  { %v947_v0 = vadd.f32 %v946_v51, %v945_v58  ;;  %v973_v1 = vadd.f32 %v972_v52, %v971_v41 }
 0x268   :  { %v960_v15 = vadd.f32 %v959_v53, %v958_v44  ;;  %v986_v61 = vadd.f32 %v985_v54, %v984_v45 }
 0x269   :  { %v948_v16 = vrot.slane %v947_v0, 2  ;;  %v974_v17 = vrot.slane %v973_v1, 2 }
 0x26a   :  { %v961_v23 = vrot.slane %v960_v15, 2  ;;  %v987_v24 = vrot.slane %v986_v61, 2 }
 0x26b   :  { %v949_v28 = vadd.f32 %v948_v16, %v947_v0  ;;  %v975_v62 = vadd.f32 %v974_v17, %v973_v1 }
 0x26c   :  { %v962_v25 = vadd.f32 %v961_v23, %v960_v15  ;;  %v988_v29 = vadd.f32 %v987_v24, %v986_v61 }
 0x26d   :  { %v950_v32 = vrot.slane %v949_v28, 1  ;;  %v976_v33 = vrot.slane %v975_v62, 1 }
 0x26e   :  { %v963_v14 = vrot.slane %v962_v25, 1  ;;  %v989_v5 = vrot.slane %v988_v29, 1 }
 0x26f   :  { %v951_v37 = vadd.f32 %v950_v32, %v949_v28  ;;  %v977_v56 = vadd.f32 %v976_v33, %v975_v62 }
 0x270   :  { %v964_v58 = vadd.f32 %v963_v14, %v962_v25  ;;  %v990_v41 = vadd.f32 %v989_v5, %v988_v29 }
 0x271   :  { %v991_v7 = vmul.f32 0.015625, %v951_v37  ;;  %v993_v8 = vmul.f32 0.015625, %v977_v56 }
 0x272   :  { %v994_v15 = vmul.f32 0.015625, %v990_v41 }
 0x273   :  { %v2671_v44 = vsub.f32 %v2592_v46, %v991_v7  ;;  %v2674_v45 = vsub.f32 %v2600_v49, %v991_v7  ;;  %v2677_v51 = vsub.f32 %v2616_v60, %v991_v7  ;;  %v2680_v52 = vsub.f32 %v2628_v13, %v991_v7 }
 0x274   :  { %v2682_v53 = vsub.f32 %v847_v26, %v991_v7  ;;  %v2684_v54 = vsub.f32 %v851_v30, %v991_v7  ;;  %v2686_v0 = vsub.f32 %v857_v6, %v991_v7  ;;  %v2688_v1 = vsub.f32 %v861_v39, %v991_v7 }
 0x275   :  { %v1027_v46 = vmul.f32 %v2671_v44, %v2671_v44  ;;  %v1031_v49 = vmul.f32 %v2674_v45, %v2674_v45  ;;  %v1035_v60 = vmul.f32 %v2677_v51, %v2677_v51  ;;  %v1039_v13 = vmul.f32 %v2680_v52, %v2680_v52 }
 0x276   :  { %v992_v26 = vmul.f32 0.015625, %v964_v58  ;;  %v2699_v6 = vsub.f32 %v2594_v47, %v993_v8  ;;  %v2702_v39 = vsub.f32 %v2602_v50, %v993_v8  ;;  %v2705_v61 = vsub.f32 %v2618_v55, %v993_v8 }
 0x277   :  { %v1059_v30 = vadd.f32 %v1031_v49, %v1027_v46  ;;  %v2708_v16 = vsub.f32 %v2630_v11, %v993_v8  ;;  %v2711_v17 = vsub.f32 %v2640_v27, %v993_v8  ;;  %v2714_v23 = vsub.f32 %v2649_v31, %v993_v8 }
 0x278   :  { %v2716_v24 = vsub.f32 %v930_v36, %v993_v8  ;;  %v2718_v47 = vsub.f32 %v934_v40, %v993_v8  ;;  %v1029_v50 = vmul.f32 %v2699_v6, %v2699_v6  ;;  %v1033_v55 = vmul.f32 %v2702_v39, %v2702_v39 }
 0x279   :  { %v1060_v28 = vadd.f32 %v1059_v30, %v1035_v60  ;;  %v1043_v11 = vmul.f32 %v2682_v53, %v2682_v53  ;;  %v1047_v27 = vmul.f32 %v2684_v54, %v2684_v54  ;;  %v1051_v31 = vmul.f32 %v2686_v0, %v2686_v0 }
 0x27a   :  { %v1055_v36 = vmul.f32 %v2688_v1, %v2688_v1  ;;  %v1037_v62 = vmul.f32 %v2705_v61, %v2705_v61  ;;  %v1041_v25 = vmul.f32 %v2708_v16, %v2708_v16  ;;  %v1085_v29 = vadd.f32 %v1033_v55, %v1029_v50 }
 0x27b   :  { %v1061_v40 = vadd.f32 %v1060_v28, %v1039_v13  ;;  %v2737_v32 = vsub.f32 %v2596_v48, %v992_v26  ;;  %v2740_v33 = vsub.f32 %v2608_v9, %v992_v26  ;;  %v2743_v14 = vsub.f32 %v2622_v3, %v992_v26 }
 0x27c   :  { %v2746_v5 = vsub.f32 %v2634_v20, %v992_v26  ;;  %v1086_v56 = vadd.f32 %v1085_v29, %v1037_v62  ;;  %v2749_v7 = vsub.f32 %v2643_v63, %v992_v26  ;;  %v2752_v8 = vsub.f32 %v2652_v34, %v992_v26 }
 0x27d   :  { %v1062_v37 = vadd.f32 %v1061_v40, %v1043_v11  ;;  %v2755_v48 = vsub.f32 %v2658_v57, %v992_v26  ;;  %v2758_v9 = vsub.f32 %v2664_v42, %v992_v26  ;;  %v1028_v3 = vmul.f32 %v2737_v32, %v2737_v32 }
 0x27e   :  { %v1032_v20 = vmul.f32 %v2740_v33, %v2740_v33  ;;  %v1045_v63 = vmul.f32 %v2711_v17, %v2711_v17  ;;  %v1049_v34 = vmul.f32 %v2714_v23, %v2714_v23  ;;  %v1087_v41 = vadd.f32 %v1086_v56, %v1041_v25 }
 0x27f   :  { %v1063_v58 = vadd.f32 %v1062_v37, %v1047_v27  ;;  %v1053_v57 = vmul.f32 %v2716_v24, %v2716_v24  ;;  %v1057_v42 = vmul.f32 %v2718_v47, %v2718_v47  ;;  %v1036_v46 = vmul.f32 %v2743_v14, %v2743_v14 }
 0x280   :  { %v1040_v49 = vmul.f32 %v2746_v5, %v2746_v5  ;;  %v1088_v13 = vadd.f32 %v1087_v41, %v1045_v63  ;;  %v1072_v26 = vadd.f32 %v1032_v20, %v1028_v3  ;;  %v2777_v30 = vsub.f32 %v2598_v59, %v994_v15 }
 0x281   :  { %v1064_v60 = vadd.f32 %v1063_v58, %v1051_v31  ;;  %v2780_v28 = vsub.f32 %v2610_v10, %v994_v15  ;;  %v2783_v50 = vsub.f32 %v2624_v12, %v994_v15  ;;  %v2786_v55 = vsub.f32 %v2636_v21, %v994_v15 }
 0x282   :  { %v2789_v11 = vsub.f32 %v2645_v22, %v994_v15  ;;  %v1089_v40 = vadd.f32 %v1088_v13, %v1049_v34  ;;  %v1073_v31 = vadd.f32 %v1072_v26, %v1036_v46  ;;  %v2792_v62 = vsub.f32 %v2654_v35, %v994_v15 }
 0x283   :  { %v1065_v27 = vadd.f32 %v1064_v60, %v1055_v36  ;;  %v2795_v59 = vsub.f32 %v2660_v38, %v994_v15  ;;  %v2798_v10 = vsub.f32 %v2666_v43, %v994_v15  ;;  %v1030_v12 = vmul.f32 %v2777_v30, %v2777_v30 }
 0x284   :  { %v1034_v21 = vmul.f32 %v2780_v28, %v2780_v28  ;;  %v1090_v25 = vadd.f32 %v1089_v40, %v1053_v57  ;;  %v1044_v36 = vmul.f32 %v2749_v7, %v2749_v7  ;;  %v1074_v29 = vadd.f32 %v1073_v31, %v1040_v49 }
 0x285   :  { %v1066_v22 = vrot.slane %v1065_v27, 4  ;;  %v1048_v38 = vmul.f32 %v2752_v8, %v2752_v8  ;;  %v1038_v43 = vmul.f32 %v2783_v50, %v2783_v50  ;;  %v1052_v58 = vmul.f32 %v2755_v48, %v2755_v48 }
 0x286   :  { %v1091_v37 = vadd.f32 %v1090_v25, %v1057_v42  ;;  %v1075_v56 = vadd.f32 %v1074_v29, %v1044_v36  ;;  %v1098_v15 = vadd.f32 %v1034_v21, %v1030_v12  ;;  %v1042_v34 = vmul.f32 %v2786_v55, %v2786_v55 }
 0x287   :  { %v1067_v35 = vadd.f32 %v1066_v22, %v1065_v27  ;;  %v1056_v46 = vmul.f32 %v2758_v9, %v2758_v9  ;;  %v1046_v60 = vmul.f32 %v2789_v11, %v2789_v11  ;;  %v1050_v31 = vmul.f32 %v2792_v62, %v2792_v62 }
 0x288   :  { %v1092_v20 = vrot.slane %v1091_v37, 4  ;;  %v1076_v63 = vadd.f32 %v1075_v56, %v1048_v38  ;;  %v1099_v41 = vadd.f32 %v1098_v15, %v1038_v43  ;;  %v1054_v25 = vmul.f32 %v2795_v59, %v2795_v59 }
 0x289   :  { %v1068_v3 = vrot.slane %v1067_v35, 2 }
 0x28a   :  { %v1093_v42 = vadd.f32 %v1092_v20, %v1091_v37  ;;  %v1077_v49 = vadd.f32 %v1076_v63, %v1052_v58  ;;  %v1100_v13 = vadd.f32 %v1099_v41, %v1042_v34  ;;  %v1058_v37 = vmul.f32 %v2798_v10, %v2798_v10 }
 0x28b   :  { %v1069_v57 = vadd.f32 %v1068_v3, %v1067_v35 }
 0x28c   :  { %v1094_v27 = vrot.slane %v1093_v42, 2  ;;  %v1078_v40 = vadd.f32 %v1077_v49, %v1056_v46  ;;  %v1101_v12 = vadd.f32 %v1100_v13, %v1046_v60 }
 0x28d   :  { %v1070_v26 = vrot.slane %v1069_v57, 1 }
 0x28e   :  { %v1079_v21 = vrot.slane %v1078_v40, 4  ;;  %v1095_v22 = vadd.f32 %v1094_v27, %v1093_v42  ;;  %v1102_v36 = vadd.f32 %v1101_v12, %v1050_v31 }
 0x28f   :  { %v1071_v29 = vadd.f32 %v1070_v26, %v1069_v57 }
 0x290   :  { %v1080_v35 = vadd.f32 %v1079_v21, %v1078_v40  ;;  %v1103_v38 = vadd.f32 %v1102_v36, %v1054_v25  ;;  %v1096_v43 = vrot.slane %v1095_v22, 1 }
 0x291   :  { %v1111_v3 = vmul.f32 0.015625, %v1071_v29 }
 0x292   :  { %v1081_v56 = vrot.slane %v1080_v35, 2  ;;  %v1104_v15 = vadd.f32 %v1103_v38, %v1058_v37  ;;  %v1097_v34 = vadd.f32 %v1096_v43, %v1095_v22 }
 0x293   :  { %v1116_v42 = vadd.f32 1e-05, %v1111_v3 }
 0x294   :  { %v1082_v20 = vadd.f32 %v1081_v56, %v1080_v35  ;;  %v1105_v58 = vrot.slane %v1104_v15, 4  ;;  %v1113_v13 = vmul.f32 0.015625, %v1097_v34 }
 0x295   :  { %2241 = vrsqrt.f32 %v1116_v42 }
 0x296   :  { %v1083_v63 = vrot.slane %v1082_v20, 1  ;;  %v1106_v41 = vadd.f32 %v1105_v58, %v1104_v15  ;;  %v1118_v40 = vadd.f32 1e-05, %v1113_v13  ;;  %v1115_v15 = vld [vmem:[%s2997_s5] sm:$0xf]  ;;  %v1169_v58 = vsub.s32 3, %v2533_v2 }
 0x298   :  { %v1084_v46 = vadd.f32 %v1083_v63, %v1082_v20  ;;  %v1107_v49 = vrot.slane %v1106_v41, 2  ;;  %v1165_v20 = vsub.s32 2, %v2533_v2  ;;  %v1207_v63 = vld [vmem:[%s2998_s6] sm:$0xf] }
 0x299   :  { %v2838_v42 = vrot.slane %v1207_v63, %v2547_v19  ;;  %v2851_v2 = vrot.slane %v1207_v63, %v2544_v18 }
 0x29a   :  { %v1112_v60 = vmul.f32 0.015625, %v1084_v46  ;;  %v1108_v57 = vadd.f32 %v1107_v49, %v1106_v41  ;;  %v2835_v41 = vrot.slane %v1207_v63, %v1169_v58  ;;  %v2853_v13 = vrot.slane %v1207_v63, %v1165_v20 }
 0x29c   :  { %v1117_v26 = vadd.f32 1e-05, %v1112_v60  ;;  %v1109_v27 = vrot.slane %v1108_v57, 1 }
 0x29e   :  { %2243 = vrsqrt.f32 %v1117_v26  ;;  %v1110_v31 = vadd.f32 %v1109_v27, %v1108_v57 }
 0x29f   :  { %2245 = vrsqrt.f32 %v1118_v40  ;;  %v2242_v25 = vpop.eup %2241 }
 0x2a0   :  { %v1114_v12 = vmul.f32 0.015625, %v1110_v31 }
 0x2a2   :  { %v1119_v21 = vadd.f32 1e-05, %v1114_v12 }
 0x2a4   :  { %2247 = vrsqrt.f32 %v1119_v21 }
 0x2a8   :  { %v2244_v36 = vpop.eup %2243 }
 0x2a9   :  { %v1128_v22 = vcombine.low %v2242_v25, %v2244_v36  ;;  %v2246_v29 = vpop.eup %2245 }
 0x2ab   :  { %v1136_v37 = vrot.slane %v1128_v22, %v2536_v4 }
 0x2ae   :  { %v2248_v35 = vpop.eup %2247 }
 0x2af   :  { %v1129_v38 = vcombine.low %v2246_v29, %v2248_v35 }
 0x2b1   :  { %v1143_v56 = vrot.slane %v1129_v38, %v2536_v4 }
 0x2b3   :  { %v1144_v43 = vcombine.low %v1136_v37, %v1143_v56 }
 0x2b5   :  { %v1151_v3 = vrot.slane %v1144_v43, %v2536_v4 }
 0x2b7   :  { %v1153_v34 = vmul.f32 %v1151_v3, %v1115_v15 }
 0x2b9   :  { %v2841_v46 = vrot.slane %v1153_v34, %v2544_v18  ;;  %v2844_v49 = vrot.slane %v1153_v34, %v2547_v19  ;;  %v2846_v4 = vrot.slane %v1153_v34, %v1165_v20  ;;  %v2848_v60 = vrot.slane %v1153_v34, %v1169_v58 }
 0x2bb   :  { %v1206_v57 = vmul.f32 %v2848_v60, %v2798_v10  ;;  %v1176_v26 = vmul.f32 %v2844_v49, %v2737_v32  ;;  %v1180_v27 = vmul.f32 %v2844_v49, %v2740_v33  ;;  %v1178_v19 = vmul.f32 %v2848_v60, %v2777_v30 }
 0x2bc   :  { %v1182_v40 = vmul.f32 %v2848_v60, %v2780_v28  ;;  %v1175_v18 = vmul.f32 %v2841_v46, %v2671_v44  ;;  %v1179_v31 = vmul.f32 %v2841_v46, %v2674_v45  ;;  %v1177_v10 = vmul.f32 %v2846_v4, %v2699_v6 }
 0x2bd   :  { %v2872_v32 = vadd.f32 %v2835_v41, %v1206_v57  ;;  %v1230_v33 = vadd.f32 %v2838_v42, %v1176_v26  ;;  %v1234_v12 = vadd.f32 %v2838_v42, %v1180_v27  ;;  %v1232_v30 = vadd.f32 %v2835_v41, %v1178_v19 }
 0x2be   :  { %v1236_v28 = vadd.f32 %v2835_v41, %v1182_v40  ;;  %v1229_v21 = vadd.f32 %v2851_v2, %v1175_v18  ;;  %v1233_v44 = vadd.f32 %v2851_v2, %v1179_v31  ;;  %v1181_v45 = vmul.f32 %v2846_v4, %v2702_v39 }
 0x2bf   :  { %v1262_v25 = vmax.f32 %v1230_v33, 0.0  ;;  %v1266_v6 = vmax.f32 %v1234_v12, 0.0  ;;  %v1264_v36 = vmax.f32 %v1232_v30, 0.0  ;;  %v1231_v22 = vadd.f32 %v2853_v13, %v1177_v10 }
 0x2c0   :  { %v1268_v29 = vmax.f32 %v1236_v28, 0.0  ;;  %v1261_v35 = vmax.f32 %v1229_v21, 0.0  ;;  %v1265_v37 = vmax.f32 %v1233_v44, 0.0  ;;  %v1235_v38 = vadd.f32 %v2853_v13, %v1181_v45 }
 0x2c1   :  { %v1294_v56 = vpack.c.bf16 %v1266_v6, %v1262_v25  ;;  %v1263_v43 = vmax.f32 %v1231_v22, 0.0  ;;  %v1184_v15 = vmul.f32 %v2844_v49, %v2743_v14  ;;  %v1188_v3 = vmul.f32 %v2844_v49, %v2746_v5 }
 0x2c2   :  { %v1296_v20 = vpack.c.bf16 %v1268_v29, %v1264_v36  ;;  %v1293_v39 = vpack.c.bf16 %v1265_v37, %v1261_v35  ;;  %v1267_v58 = vmax.f32 %v1235_v38, 0.0  ;;  %v1186_v63 = vmul.f32 %v2848_v60, %v2783_v50 }
 0x2c3   :  { %1604 = vmatprep.mubr.bf16.mxu1 %v1294_v56  ;;  %v1238_v34 = vadd.f32 %v2838_v42, %v1184_v15  ;;  %v1242_v57 = vadd.f32 %v2838_v42, %v1188_v3  ;;  %v1190_v26 = vmul.f32 %v2848_v60, %v2786_v55  ;;  %v1183_v14 = vmul.f32 %v2841_v46, %v2677_v51 }
 0x2c4   :  { %1669 = vmatprep.mubr.bf16.mxu0 %v1296_v20  ;;  %1605 = vmatmul.mubr.bf16.vlgmr.msra.gmra.mrb[16].mxu1 %v1293_v39  ;;  %v1295_v5 = vpack.c.bf16 %v1267_v58, %v1263_v43  ;;  %v1240_v27 = vadd.f32 %v2835_v41, %v1186_v63  ;;  %v1187_v19 = vmul.f32 %v2841_v46, %v2680_v52  ;;  %v1292_v50 = vmax.f32 %v2872_v32, 0.0 }
 0x2c5   :  { %v1270_v40 = vmax.f32 %v1238_v34, 0.0  ;;  %v1274_v18 = vmax.f32 %v1242_v57, 0.0  ;;  %v1244_v31 = vadd.f32 %v2835_v41, %v1190_v26  ;;  %v1237_v10 = vadd.f32 %v2851_v2, %v1183_v14 }
 0x2c6   :  { %1670 = vmatmul.mubr.bf16.vlgmr.msra.gmra.mrb[32].mxu0 %v1295_v5  ;;  %v1272_v55 = vmax.f32 %v1240_v27, 0.0  ;;  %v1241_v51 = vadd.f32 %v2851_v2, %v1187_v19  ;;  %v1185_v33 = vmul.f32 %v2846_v4, %v2705_v61  ;;  %v1189_v12 = vmul.f32 %v2846_v4, %v2708_v16 }
 0x2c7   :  { %v1298_v30 = vpack.c.bf16 %v1274_v18, %v1270_v40  ;;  %v1276_v52 = vmax.f32 %v1244_v31, 0.0  ;;  %v1269_v28 = vmax.f32 %v1237_v10, 0.0  ;;  %v1192_v21 = vmul.f32 %v2844_v49, %v2749_v7 }
 0x2c8   :  { %v1273_v44 = vmax.f32 %v1241_v51, 0.0  ;;  %v1239_v45 = vadd.f32 %v2853_v13, %v1185_v33  ;;  %v1243_v25 = vadd.f32 %v2853_v13, %v1189_v12  ;;  %v1196_v6 = vmul.f32 %v2844_v49, %v2752_v8 }
 0x2c9   :  { %1612 = vmatprep.mubr.bf16.mxu1 %v1298_v30  ;;  %v1300_v36 = vpack.c.bf16 %v1276_v52, %v1272_v55  ;;  %v1246_v61 = vadd.f32 %v2838_v42, %v1192_v21  ;;  %v1194_v16 = vmul.f32 %v2848_v60, %v2789_v11  ;;  %v1198_v22 = vmul.f32 %v2848_v60, %v2792_v62 }
 0x2ca   :  { %v1297_v29 = vpack.c.bf16 %v1273_v44, %v1269_v28  ;;  %v1271_v7 = vmax.f32 %v1239_v45, 0.0  ;;  %v1275_v35 = vmax.f32 %v1243_v25, 0.0  ;;  %v1250_v37 = vadd.f32 %v2838_v42, %v1196_v6 }
 0x2cb   :  { %1677 = vmatprep.mubr.bf16.mxu0 %v1300_v36  ;;  %v1278_v38 = vmax.f32 %v1246_v61, 0.0  ;;  %v1248_v56 = vadd.f32 %v2835_v41, %v1194_v16  ;;  %v1252_v8 = vadd.f32 %v2835_v41, %v1198_v22  ;;  %v1191_v43 = vmul.f32 %v2841_v46, %v2682_v53 }
 0x2cc   :  { %1613 = vmatmul.mubr.bf16.gmra.mrb[20].mxu1 %v1297_v29  ;;  %v1299_v15 = vpack.c.bf16 %v1275_v35, %v1271_v7  ;;  %v1282_v11 = vmax.f32 %v1250_v37, 0.0  ;;  %v1195_v62 = vmul.f32 %v2841_v46, %v2684_v54  ;;  %v1193_v3 = vmul.f32 %v2846_v4, %v2711_v17 }
 0x2cd   :  { %v1280_v20 = vmax.f32 %v1248_v56, 0.0  ;;  %v1284_v39 = vmax.f32 %v1252_v8, 0.0  ;;  %v1245_v58 = vadd.f32 %v2851_v2, %v1191_v43  ;;  %v1197_v63 = vmul.f32 %v2846_v4, %v2714_v23 }
 0x2ce   :  { %1678 = vmatmul.mubr.bf16.gmra.mrb[36].mxu0 %v1299_v15  ;;  %v1302_v34 = vpack.c.bf16 %v1282_v11, %v1278_v38  ;;  %v1249_v53 = vadd.f32 %v2851_v2, %v1195_v62  ;;  %v1247_v57 = vadd.f32 %v2853_v13, %v1193_v3  ;;  %v1200_v26 = vmul.f32 %v2844_v49, %v2755_v48 }
 0x2cf   :  { %v1304_v54 = vpack.c.bf16 %v1284_v39, %v1280_v20  ;;  %v1277_v14 = vmax.f32 %v1245_v58, 0.0  ;;  %v1251_v17 = vadd.f32 %v2853_v13, %v1197_v63  ;;  %v1204_v5 = vmul.f32 %v2844_v49, %v2758_v9 }
 0x2d0   :  { %1620 = vmatprep.mubr.bf16.mxu1 %v1302_v34  ;;  %v1281_v27 = vmax.f32 %v1249_v53, 0.0  ;;  %v1279_v19 = vmax.f32 %v1247_v57, 0.0  ;;  %v1254_v23 = vadd.f32 %v2838_v42, %v1200_v26  ;;  %v1202_v40 = vmul.f32 %v2848_v60, %v2795_v59 }
 0x2d1   :  { %1685 = vmatprep.mubr.bf16.mxu0 %v1304_v54  ;;  %v1283_v18 = vmax.f32 %v1251_v17, 0.0  ;;  %v1258_v31 = vadd.f32 %v2838_v42, %v1204_v5  ;;  %v1199_v48 = vmul.f32 %v2841_v46, %v2686_v0  ;;  %v1203_v10 = vmul.f32 %v2841_v46, %v2688_v1 }
 0x2d2   :  { %v1301_v55 = vpack.c.bf16 %v1281_v27, %v1277_v14  ;;  %v1286_v9 = vmax.f32 %v1254_v23, 0.0  ;;  %v1256_v49 = vadd.f32 %v2835_v41, %v1202_v40  ;;  %v1201_v51 = vmul.f32 %v2846_v4, %v2716_v24 }
 0x2d3   :  { %v1290_v33 = vmax.f32 %v1258_v31, 0.0  ;;  %v1253_v59 = vadd.f32 %v2851_v2, %v1199_v48  ;;  %v1257_v60 = vadd.f32 %v2851_v2, %v1203_v10  ;;  %v1303_v42 = vpack.c.bf16 %v1283_v18, %v1279_v19 }
 0x2d4   :  { %1621 = vmatmul.mubr.bf16.gmra.mrb[24].mxu1 %v1301_v55  ;;  %v1288_v12 = vmax.f32 %v1256_v49, 0.0  ;;  %v1205_v0 = vmul.f32 %v2846_v4, %v2718_v47  ;;  %v1255_v1 = vadd.f32 %v2853_v13, %v1201_v51  ;;  %v2959_v4 = vld [vmem:[%s3000_s8] ss:$0 sm:$0xff]  ;;  %s2361_s8 = smov [#allocation7]  }
 0x2d5   :  { %v1306_v46 = vpack.c.bf16 %v1290_v33, %v1286_v9  ;;  %v1285_v30 = vmax.f32 %v1253_v59, 0.0  ;;  %v1289_v24 = vmax.f32 %v1257_v60, 0.0  ;;  %s1843_s18 = sshll.u32 %s2361_s8, 4  ;;  %s1844_s18 = int_to_ptr.vmem [resolvable:$true] %s1843_s18 }
 0x2d6   :  { %1686 = vmatmul.mubr.bf16.gmra.mrb[40].mxu0 %v1303_v42  ;;  %v1308_v41 = vpack.c.bf16 %v1292_v50, %v1288_v12  ;;  %v1259_v52 = vadd.f32 %v2853_v13, %v1205_v0  ;;  %v1287_v2 = vmax.f32 %v1255_v1, 0.0  ;;  %s2325_s19 = scalar_lea.vmem %s1844_s18, 512  ;;  %p2330_p3 = scmp.lt.s32.totalorder %s1844_s18, %s1844_s18 }
 0x2d7   :  { %1628 = vmatprep.mubr.bf16.mxu1 %v1306_v46  ;;  %v1305_v21 = vpack.c.bf16 %v1289_v24, %v1285_v30  ;;  %p2326_p2 = scmp.ne.s32.totalorder %s1844_s18, %s2325_s19  ;;  %p2331_p4 = scmp.lt.s32.totalorder %s2325_s19, %s2325_s19 }
 0x2d8   :  { %1693 = vmatprep.mubr.bf16.mxu0 %v1308_v41  ;;  %v1291_v28 = vmax.f32 %v1259_v52, 0.0 }
 0x2d9   :  { %p2332_p5 = por %p2331_p4, %p2330_p3 }
 0x2da   :  { %v1307_v44 = vpack.c.bf16 %v1291_v28, %v1287_v2 }
 0x2db   :  { %p2333_p6 = pnand %p2332_p5, %p2326_p2 }
 0x2dc   :  { %1629 = vmatmul.mubr.bf16.gmra.mrb[28].mxu1 %v1305_v21 }
 0x2de   :  { %1694 = vmatmul.mubr.bf16.gmra.mrb[44].mxu0 %v1307_v44 }
 0x397   :  { %v2023_v47 = vpop.f32.mrb[16].mxu1 }
 0x398   :  { %v2024_v32 = vpop.f32.mrb[17].mxu1 }
 0x399   :  { %v2063_v50 = vpop.f32.mrb[32].mxu0  ;;  %v2025_v45 = vadd.f32 %v2024_v32, %v2023_v47  ;;  %v2026_v25 = vpop.f32.mrb[18].mxu1 }
 0x39a   :  { %v2064_v6 = vpop.f32.mrb[33].mxu0  ;;  %v2027_v13 = vpop.f32.mrb[19].mxu1 }
 0x39b   :  { %v1607_v36 = vadd.f32 %v2025_v45, %v2959_v4  ;;  %v2065_v61 = vadd.f32 %v2064_v6, %v2063_v50  ;;  %v2066_v16 = vpop.f32.mrb[34].mxu0  ;;  %v2028_v22 = vadd.f32 %v2027_v13, %v2026_v25 }
 0x39c   :  { %v2067_v29 = vpop.f32.mrb[35].mxu0 }
 0x39d   :  { %v1610_v7 = vadd.f32 %v2028_v22, %v2959_v4  ;;  %v2068_v35 = vadd.f32 %v2067_v29, %v2066_v16  ;;  %v1672_v37 = vadd.f32 %v2065_v61, %v1607_v36 }
 0x39f   :  { %v2029_v38 = vpop.f32.mrb[20].mxu1  ;;  %1702 = vmax.xlane.f32.xlu0 %v1672_v37  ;;  %v1675_v56 = vadd.f32 %v2068_v35, %v1610_v7 }
 0x3a0   :  { %v2030_v8 = vpop.f32.mrb[21].mxu1 }
 0x3a1   :  { %v2069_v43 = vpop.f32.mrb[36].mxu0  ;;  %v2031_v15 = vadd.f32 %v2030_v8, %v2029_v38  ;;  %v2032_v11 = vpop.f32.mrb[22].mxu1 }
 0x3a2   :  { %v2070_v62 = vpop.f32.mrb[37].mxu0  ;;  %v2033_v3 = vpop.f32.mrb[23].mxu1 }
 0x3a3   :  { %v1615_v20 = vadd.f32 %v2031_v15, %v2959_v4  ;;  %v2071_v39 = vadd.f32 %v2070_v62, %v2069_v43  ;;  %v2072_v58 = vpop.f32.mrb[38].mxu0  ;;  %v2034_v63 = vadd.f32 %v2033_v3, %v2032_v11  ;;  %1704 = vmax.xlane.f32.xlu0 %v1675_v56 }
 0x3a4   :  { %v2073_v34 = vpop.f32.mrb[39].mxu0 }
 0x3a5   :  { %v1618_v53 = vadd.f32 %v2034_v63, %v2959_v4  ;;  %v2074_v57 = vadd.f32 %v2073_v34, %v2072_v58  ;;  %v1680_v26 = vadd.f32 %v2071_v39, %v1615_v20 }
 0x3a7   :  { %v2035_v54 = vpop.f32.mrb[24].mxu1  ;;  %1706 = vmax.xlane.f32.xlu1 %v1680_v26  ;;  %v1683_v14 = vadd.f32 %v2074_v57, %v1618_v53 }
 0x3a8   :  { %v2036_v17 = vpop.f32.mrb[25].mxu1 }
 0x3a9   :  { %v2075_v5 = vpop.f32.mrb[40].mxu0  ;;  %v2037_v27 = vadd.f32 %v2036_v17, %v2035_v54  ;;  %v2038_v19 = vpop.f32.mrb[26].mxu1 }
 0x3aa   :  { %v2076_v23 = vpop.f32.mrb[41].mxu0  ;;  %v2039_v40 = vpop.f32.mrb[27].mxu1 }
 0x3ab   :  { %v1623_v18 = vadd.f32 %v2037_v27, %v2959_v4  ;;  %v2077_v31 = vadd.f32 %v2076_v23, %v2075_v5  ;;  %v2078_v48 = vpop.f32.mrb[42].mxu0  ;;  %v2040_v10 = vadd.f32 %v2039_v40, %v2038_v19  ;;  %1708 = vmax.xlane.f32.xlu1 %v1683_v14 }
 0x3ac   :  { %v2079_v55 = vpop.f32.mrb[43].mxu0 }
 0x3ad   :  { %v1626_v9 = vadd.f32 %v2040_v10, %v2959_v4  ;;  %v2080_v49 = vadd.f32 %v2079_v55, %v2078_v48  ;;  %v1688_v51 = vadd.f32 %v2077_v31, %v1623_v18 }
 0x3af   :  { %v2041_v33 = vpop.f32.mrb[28].mxu1  ;;  %1710 = vmax.xlane.f32.xlu0 %v1688_v51  ;;  %v1691_v59 = vadd.f32 %v2080_v49, %v1626_v9 }
 0x3b0   :  { %v2042_v60 = vpop.f32.mrb[29].mxu1 }
 0x3b1   :  { %v2081_v42 = vpop.f32.mrb[44].mxu0  ;;  %v2043_v12 = vadd.f32 %v2042_v60, %v2041_v33  ;;  %v2044_v0 = vpop.f32.mrb[30].mxu1  ;;  %1712 = vmax.xlane.f32.xlu1 %v1691_v59 }
 0x3b2   :  { %v2082_v1 = vpop.f32.mrb[45].mxu0  ;;  %v2045_v46 = vpop.f32.mrb[31].mxu1 }
 0x3b3   :  { %v1631_v41 = vadd.f32 %v2043_v12, %v2959_v4  ;;  %v2083_v30 = vadd.f32 %v2082_v1, %v2081_v42  ;;  %v2084_v24 = vpop.f32.mrb[46].mxu0  ;;  %v2046_v52 = vadd.f32 %v2045_v46, %v2044_v0 }
 0x3b4   :  { %v2085_v2 = vpop.f32.mrb[47].mxu0 }
 0x3b5   :  { %v1634_v28 = vadd.f32 %v2046_v52, %v2959_v4  ;;  %v2086_v21 = vadd.f32 %v2085_v2, %v2084_v24  ;;  %v1696_v44 = vadd.f32 %v2083_v30, %v1631_v41 }
 0x3b7   :  { %1714 = vmax.xlane.f32.xlu0 %v1696_v44  ;;  %v1699_v47 = vadd.f32 %v2086_v21, %v1634_v28 }
 0x3b9   :  { %1716 = vmax.xlane.f32.xlu1 %v1699_v47 }
 0x42c   :  { %v1703_v32 = vpop.xlane.xlu0 %1702 }
 0x42d   :  { %v1718_v50 = vsub.f32 %v1672_v37, %v1703_v32 }
 0x42f   :  { %v1726_v45 = vmul.f32 1.442695, %v1718_v50 }
 0x430   :  { %v1705_v25 = vpop.xlane.xlu0 %1704 }
 0x431   :  { %2249 = vpow2.f32 %v1726_v45  ;;  %v1719_v6 = vsub.f32 %v1675_v56, %v1705_v25 }
 0x433   :  { %v1728_v13 = vmul.f32 1.442695, %v1719_v6 }
 0x434   :  { %v1707_v36 = vpop.xlane.xlu1 %1706 }
 0x435   :  { %2251 = vpow2.f32 %v1728_v13  ;;  %v1720_v61 = vsub.f32 %v1680_v26, %v1707_v36 }
 0x437   :  { %v1730_v16 = vmul.f32 1.442695, %v1720_v61 }
 0x438   :  { %v1709_v22 = vpop.xlane.xlu1 %1708 }
 0x439   :  { %2253 = vpow2.f32 %v1730_v16  ;;  %v1721_v29 = vsub.f32 %v1683_v14, %v1709_v22 }
 0x43b   :  { %v2250_v4 = vpop.eup %2249  ;;  %v1732_v7 = vmul.f32 1.442695, %v1721_v29 }
 0x43c   :  { %1742 = vadd.xlane.f32.xlu0 %v2250_v4  ;;  %v1711_v35 = vpop.xlane.xlu0 %1710 }
 0x43d   :  { %2255 = vpow2.f32 %v1732_v7  ;;  %v1722_v38 = vsub.f32 %v1688_v51, %v1711_v35 }
 0x43e   :  { %v1713_v8 = vpop.xlane.xlu1 %1712 }
 0x43f   :  { %v2252_v37 = vpop.eup %2251  ;;  %v1734_v43 = vmul.f32 1.442695, %v1722_v38  ;;  %v1723_v15 = vsub.f32 %v1691_v59, %v1713_v8 }
 0x440   :  { %1744 = vadd.xlane.f32.xlu1 %v2252_v37 }
 0x441   :  { %2257 = vpow2.f32 %v1734_v43  ;;  %v1736_v56 = vmul.f32 1.442695, %v1723_v15 }
 0x443   :  { %v2254_v11 = vpop.eup %2253  ;;  %2259 = vpow2.f32 %v1736_v56 }
 0x444   :  { %1746 = vadd.xlane.f32.xlu0 %v2254_v11  ;;  %v1715_v62 = vpop.xlane.xlu0 %1714 }
 0x445   :  { %v1724_v3 = vsub.f32 %v1696_v44, %v1715_v62 }
 0x446   :  { %v1717_v20 = vpop.xlane.xlu1 %1716 }
 0x447   :  { %v2256_v39 = vpop.eup %2255  ;;  %v1738_v58 = vmul.f32 1.442695, %v1724_v3  ;;  %v1725_v63 = vsub.f32 %v1699_v47, %v1717_v20 }
 0x448   :  { %1748 = vadd.xlane.f32.xlu1 %v2256_v39 }
 0x449   :  { %2261 = vpow2.f32 %v1738_v58  ;;  %v1740_v34 = vmul.f32 1.442695, %v1725_v63 }
 0x44b   :  { %v2258_v53 = vpop.eup %2257  ;;  %2263 = vpow2.f32 %v1740_v34 }
 0x44c   :  { %1750 = vadd.xlane.f32.xlu0 %v2258_v53 }
 0x44d   :  { %v2260_v57 = vpop.eup %2259 }
 0x44e   :  { %1752 = vadd.xlane.f32.xlu1 %v2260_v57 }
 0x453   :  { %v2969_v26 = vpop.eup %2261 }
 0x454   :  { %1754 = vadd.xlane.f32.xlu0 %v2969_v26 }
 0x455   :  { %v2972_v54 = vpop.eup %2263 }
 0x456   :  { %1756 = vadd.xlane.f32.xlu1 %v2972_v54 }
 0x4c9   :  { %v1743_v14 = vpop.xlane.xlu0 %1742 }
 0x4ca   :  { %2265 = vrcp.f32 %v1743_v14 }
 0x4cd   :  { %v1745_v17 = vpop.xlane.xlu1 %1744 }
 0x4ce   :  { %2267 = vrcp.f32 %v1745_v17 }
 0x4d1   :  { %v1747_v5 = vpop.xlane.xlu0 %1746 }
 0x4d2   :  { %2269 = vrcp.f32 %v1747_v5 }
 0x4d4   :  { %v2266_v27 = vpop.eup %2265 }
 0x4d5   :  { %v1766_v19 = vmul.f32 %v2266_v27, %v1743_v14  ;;  %v1749_v23 = vpop.xlane.xlu1 %1748 }
 0x4d6   :  { %2271 = vrcp.f32 %v1749_v23 }
 0x4d7   :  { %v1774_v40 = vsub.f32 2.0, %v1766_v19 }
 0x4d8   :  { %v2268_v18 = vpop.eup %2267 }
 0x4d9   :  { %v1767_v31 = vmul.f32 %v2268_v18, %v1745_v17  ;;  %v1751_v48 = vpop.xlane.xlu0 %1750  ;;  %v1782_v10 = vmul.f32 %v2266_v27, %v1774_v40 }
 0x4da   :  { %2273 = vrcp.f32 %v1751_v48 }
 0x4db   :  { %v1775_v55 = vsub.f32 2.0, %v1767_v31  ;;  %v1753_v9 = vpop.xlane.xlu1 %1752  ;;  %v1790_v59 = vmul.f32 %v2250_v4, %v1782_v10 }
 0x4dc   :  { %v2270_v49 = vpop.eup %2269  ;;  %2275 = vrcp.f32 %v1753_v9 }
 0x4dd   :  { %v1783_v51 = vmul.f32 %v2268_v18, %v1775_v55  ;;  %v1768_v33 = vmul.f32 %v2270_v49, %v1747_v5 }
 0x4df   :  { %v1791_v60 = vmul.f32 %v2252_v37, %v1783_v51  ;;  %v1776_v42 = vsub.f32 2.0, %v1768_v33 }
 0x4e0   :  { %v2272_v12 = vpop.eup %2271 }
 0x4e1   :  { %v1987_v0 = vpack.c.bf16 %v1791_v60, %v1790_v59  ;;  %v1769_v1 = vmul.f32 %v2272_v12, %v1749_v23  ;;  %v1755_v46 = vpop.xlane.xlu0 %1754  ;;  %v1784_v41 = vmul.f32 %v2270_v49, %v1776_v42 }
 0x4e2   :  { %2277 = vrcp.f32 %v1755_v46 }
 0x4e3   :  { %1988 = vst [vmem:[#allocation7] sm:$0xff] %v1987_v0   ;;  %v1777_v30 = vsub.f32 2.0, %v1769_v1  ;;  %v1757_v24 = vpop.xlane.xlu1 %1756  ;;  %v1792_v44 = vmul.f32 %v2254_v11, %v1784_v41 }
 0x4e4   :  { %v2274_v52 = vpop.eup %2273  ;;  %2279 = vrcp.f32 %v1757_v24 }
 0x4e5   :  { %v1785_v2 = vmul.f32 %v2272_v12, %v1777_v30  ;;  %v1770_v28 = vmul.f32 %v2274_v52, %v1751_v48 }
 0x4e6   :  { %v2276_v21 = vpop.eup %2275 }
 0x4e7   :  { %v1793_v47 = vmul.f32 %v2256_v39, %v1785_v2  ;;  %v1778_v32 = vsub.f32 2.0, %v1770_v28  ;;  %v1771_v50 = vmul.f32 %v2276_v21, %v1753_v9 }
 0x4e9   :  { %v1992_v45 = vpack.c.bf16 %v1793_v47, %v1792_v44  ;;  %v1786_v25 = vmul.f32 %v2274_v52, %v1778_v32  ;;  %v1779_v6 = vsub.f32 2.0, %v1771_v50 }
 0x4eb   :  { %2004 = vst [vmem:[#allocation7 + $0x8] sm:$0xff] %v1992_v45   ;;  %v1787_v13 = vmul.f32 %v2276_v21, %v1779_v6  ;;  %v1794_v61 = vmul.f32 %v2258_v53, %v1786_v25 }
 0x4ec   :  { %v2278_v36 = vpop.eup %2277 }
 0x4ed   :  { %v1795_v16 = vmul.f32 %v2260_v57, %v1787_v13  ;;  %v1772_v22 = vmul.f32 %v2278_v36, %v1755_v46 }
 0x4ee   :  { %v2280_v29 = vpop.eup %2279 }
 0x4ef   :  { %v1997_v4 = vpack.c.bf16 %v1795_v16, %v1794_v61  ;;  %v1780_v7 = vsub.f32 2.0, %v1772_v22  ;;  %v1773_v35 = vmul.f32 %v2280_v29, %v1757_v24 }
 0x4f1   :  { %2005 = vst [vmem:[#allocation7 + $0x10] sm:$0xff] %v1997_v4   ;;  %v1788_v38 = vmul.f32 %v2278_v36, %v1780_v7  ;;  %v1781_v8 = vsub.f32 2.0, %v1773_v35 }
 0x4f3   :  { %v1789_v37 = vmul.f32 %v2280_v29, %v1781_v8  ;;  %v1796_v43 = vmul.f32 %v2969_v26, %v1788_v38 }
 0x4f5   :  { %v1797_v15 = vmul.f32 %v2972_v54, %v1789_v37 }
 0x4f7   :  { %v2002_v56 = vpack.c.bf16 %v1797_v15, %v1796_v43 }
 0x4f9   :  { %2006 = vst [vmem:[#allocation7 + $0x18] sm:$0xff] %v2002_v56  }
 0x4fa   :  { %2336 = shalt.err (!%p2333_p6)
}
 0x4fb   :  { %s2337_s21 = scalar_lea.hbm %s3001_s9, 512 }
 0x4fc   :  { %p2338_p7 = scmp.ne.s32.totalorder %s3001_s9, %s2337_s21  ;;  %p2341_p8 = scmp.lt.u32.totalorder %s2337_s21, %s3001_s9 }
 0x4fe   :  { %p2343_p9 = pnand %p2341_p8, %p2338_p7 }
 0x500   :  { %2346 = shalt.err (!%p2343_p9)
}
 0x501   :  { %1849 = dma.vmem_to_hbm [thread:$0]  %s1844_s18, 512, %s3001_s9, [#allocation4], %s2357_s4, %s2357_s4, %s2358_s10  }
 0x502   :  { %2351 = dma.done.wait [#allocation4], 512  }
 0x503   :  { %2352 = vsyncadd [#allocation4], 4294966784 }
 0x504   :  { %1853 = vsyncpa [#allocation3], 1 }
 0x505   :  { %1854 = vsyncpa [#allocation6], 1 }
 0x506   :  { %1855 = vsyncpa [#allocation4], 1 }

</bundles_post_ra>
